<compile_context>
chip_gen: v6e
topology: v6e:2x2x1
jax: 0.10.0
libtpu: 0.0.40
codegen_flags: <defaults>
</compile_context>

<pallas_src>
import functools
import math

import jax
import jax.numpy as jnp
from jax import lax
from jax.experimental import pallas as pl
from jax.experimental.pallas import tpu as pltpu


# --------------------------------------------------------------------------
# Pallas kernel: whole decoder, grid = (batch, layer)
# --------------------------------------------------------------------------
def _decoder_kernel(x_ref, cos_ref, sin_ref, bias_ref,
                    anw_ref, wqkv_ref, wo_ref,
                    mnw_ref, w13_ref, w2_ref,
                    fnw_ref, o_ref,
                    carry_ref, attn_ref,
                    *, n_heads, head_dim, hidden_dim, eps):
    layer = pl.program_id(1)
    n_layers = pl.num_programs(1)
    T, D = carry_ref.shape
    hd = head_dim
    hd2 = hd // 2
    H = hidden_dim
    bf = lambda t: t.astype(jnp.bfloat16)

    # First layer for this batch element: load residual stream into fp32 carry.
    @pl.when(layer == 0)
    def _():
        carry_ref[...] = x_ref[0].astype(jnp.float32)

    x = carry_ref[...]                                              # (T, D) fp32

    def rmsnorm(z, w):
        return z * lax.rsqrt(jnp.mean(z * z, axis=-1, keepdims=True) + eps) * w

    # ---- attention RMSNorm (fp32 stats) + fused QKV projection (MXU) ----
    xn = bf(rmsnorm(x, anw_ref[0]))
    qkv = jnp.dot(xn, wqkv_ref[0], preferred_element_type=jnp.float32)   # (T, 3D)
    # Fold the 1/sqrt(hd) softmax scale into q (RoPE is linear, so this is exact).
    q = qkv[:, 0 * D:1 * D] * (1.0 / math.sqrt(hd))
    k = qkv[:, 1 * D:2 * D]
    v_bf = bf(qkv[:, 2 * D:3 * D])

    # ---- full-width RoPE (lane-dense; no per-head slicing) ----
    cos = cos_ref[...]        # (T, D): [cos | cos]   per head
    sin = sin_ref[...]        # (T, D): [-sin | +sin] per head
    col = lax.broadcasted_iota(jnp.int32, (T, D), 1)
    first_half = (col % hd) < hd2

    def rope(t):
        # partner[:, j] = t[:, j + hd2] (first half) / t[:, j - hd2] (second half)
        left = jnp.concatenate([t[:, hd2:], t[:, :hd2]], axis=1)
        right = jnp.concatenate([t[:, D - hd2:], t[:, :D - hd2]], axis=1)
        partner = jnp.where(first_half, left, right)
        return bf(t * cos + partner * sin)

    q_rot = rope(q)                                                  # (T, D) bf16
    k_rot = rope(k)

    bias = bias_ref[...]      # (T, T) causal additive bias (0 / -1e30), resident

    # ---- per-head attention: one K=hd score matmul per head, outputs written
    #      into lane slices of the bf16 scratch; single out-projection after.
    for h in range(n_heads):
        base = h * hd
        s = jnp.dot(q_rot[:, base:base + hd], k_rot[:, base:base + hd].T,
                    preferred_element_type=jnp.float32) + bias        # (T, T)
        m = jnp.max(s, axis=-1, keepdims=True)
        p = jnp.exp(s - m)                                            # fp32 (EUP)
        p = p * pl.reciprocal(jnp.sum(p, axis=-1, keepdims=True), approx=True)
        oh = jnp.dot(bf(p), v_bf[:, base:base + hd],
                     preferred_element_type=jnp.float32)              # (T, hd)
        attn_ref[:, base:base + hd] = bf(oh)

    # single K=D out-projection (fills the MXU contraction depth)
    x1 = x + jnp.dot(attn_ref[...], wo_ref[0], preferred_element_type=jnp.float32)

    # ---- MLP RMSNorm + SwiGLU (w1|w3 fused into one matmul) ----
    xn2 = bf(rmsnorm(x1, mnw_ref[0]))
    h13 = jnp.dot(xn2, w13_ref[0], preferred_element_type=jnp.float32)  # (T, 2H)
    h1 = h13[:, :H]
    h3 = h13[:, H:]
    g = (h1 * jax.nn.sigmoid(h1)) * h3                                # silu(h1)*h3
    y = x1 + jnp.dot(bf(g), w2_ref[0], preferred_element_type=jnp.float32)

    carry_ref[...] = y                                                # next layer

    # Last layer: fused final RMSNorm, single store of the result.
    @pl.when(layer == n_layers - 1)
    def _():
        o_ref[0] = rmsnorm(y, fnw_ref[...]).astype(o_ref.dtype)


# --------------------------------------------------------------------------
# Host-side helpers (glue)
# --------------------------------------------------------------------------
def llama_hidden_dim(d_model, multiple_of=256):
    hidden = 4 * d_model
    hidden = int(2 * hidden / 3)
    return multiple_of * ((hidden + multiple_of - 1) // multiple_of)


def rope_tables(input_pos, head_dim, theta):
    """cos/sin tables of shape (T, head_dim // 2) (split-half convention)."""
    inv = 1.0 / (theta ** (jnp.arange(0, head_dim, 2, dtype=jnp.float32) / head_dim))
    freqs = input_pos.astype(jnp.float32)[:, None] * inv[None, :]
    return jnp.cos(freqs), jnp.sin(freqs)


def deinterleave_qk_columns(wqkv, *, n_heads, head_dim):
    """Permute Q/K output columns per head from interleaved [r0,i0,r1,i1,...]
    to split-half [r0..r_{hd/2-1}, i0..i_{hd/2-1}].  The permutation cancels in
    q.k^T, V and wo are untouched, so attention output is unchanged; it only
    turns RoPE into a half-wise lane-local operation inside the kernel."""
    D = n_heads * head_dim
    within = jnp.concatenate([jnp.arange(0, head_dim, 2),
                              jnp.arange(1, head_dim, 2)])
    qperm = (jnp.arange(n_heads)[:, None] * head_dim + within[None, :]).reshape(-1)
    col_perm = jnp.concatenate([qperm, D + qperm, 2 * D + jnp.arange(D)])
    return wqkv[:, col_perm]


def _nbytes(a):
    return int(a.size) * a.dtype.itemsize


def decoder_forward(x, input_pos, params, cfg):
    B, T, D = x.shape
    n_heads = cfg["n_heads"]
    assert cfg["n_kv_heads"] == n_heads  # MHA path (repeat_kv not exercised)
    hd = D // n_heads
    eps = cfg["norm_eps"]
    L = len(params["blocks"])
    H = params["blocks"][0]["w1"].shape[1]

    # Full-width RoPE tables matching the de-interleaved per-head [r|i] layout.
    cos_h, sin_h = rope_tables(input_pos, hd, cfg["rope_theta"])     # (T, hd/2)
    cos_full = jnp.tile(jnp.concatenate([cos_h, cos_h], axis=1), (1, n_heads))
    sin_full = jnp.tile(jnp.concatenate([-sin_h, sin_h], axis=1), (1, n_heads))
    # Causal additive bias, built once on the host; constant-index input so it
    # is fetched into VMEM once and reused by every (batch, layer) step.
    r = jnp.arange(T)
    bias = jnp.where(r[None, :] <= r[:, None], 0.0, -1e30).astype(jnp.float32)

    # Stack per-layer weights along a leading L axis so the layer index is a
    # grid axis: layer l+1 weights are prefetched while layer l computes.
    def stack(name, prep=lambda w: w, dtype=jnp.bfloat16):
        return jnp.stack([prep(b[name]) for b in params["blocks"]]).astype(dtype)

    deint = functools.partial(deinterleave_qk_columns, n_heads=n_heads, head_dim=hd)
    anw = stack("attn_norm_w", dtype=jnp.float32)                    # (L, 1, D)
    mnw = stack("mlp_norm_w", dtype=jnp.float32)                     # (L, 1, D)
    wqkv = stack("wqkv", deint)                                      # (L, D, 3D)
    wo = stack("wo")                                                 # (L, D, D)
    w13 = jnp.stack([jnp.concatenate([b["w1"], b["w3"]], axis=1)
                     for b in params["blocks"]]).astype(jnp.bfloat16)  # (L, D, 2H)
    w2 = stack("w2")                                                 # (L, H, D)
    fnw = params["norm_w"].astype(jnp.float32)                       # (1, D)

    x_spec = pl.BlockSpec((1, T, D), lambda b, l: (b, 0, 0))
    const = lambda shape: pl.BlockSpec(shape, lambda b, l: (0,) * len(shape))
    per_layer = lambda s1, s2: pl.BlockSpec((1, s1, s2), lambda b, l: (l, 0, 0))

    # Generation-aware VMEM budget: double-buffered layer weights + resident
    # constants + activation blocks + scratch + headroom, clamped to 90% of the
    # chip's physical VMEM (128 MiB on v5e/v6e, 64 MiB on v7x).
    per_layer_w = sum(_nbytes(w) for w in (anw, mnw, wqkv, wo, w13, w2)) // L
    const_b = sum(_nbytes(a) for a in (cos_full, sin_full, bias, fnw))
    need = (2 * per_layer_w + 2 * const_b
            + 4 * T * D * 4              # x / o blocks (double-buffered)
            + T * D * (4 + 2)            # fp32 carry + bf16 attn scratch
            + 8 * T * T * 4              # score / prob temporaries
            + 8 * (1 << 20))             # compiler scratch headroom
    try:
        vmem_cap = int(pltpu.get_tpu_info().vmem_capacity_bytes)
    except Exception:
        vmem_cap = 64 * 1024 * 1024
    vmem_limit = int(max(min(need, int(0.9 * vmem_cap)), 16 * (1 << 20)))

    cost = pl.CostEstimate(
        flops=int(B * L * (8 * T * D * D + 4 * T * T * D + 6 * T * D * H)),
        transcendentals=int(B * L * (n_heads * T * T + T * H)),
        bytes_accessed=int(L * per_layer_w + const_b + 2 * B * T * D * 4))

    kernel = functools.partial(_decoder_kernel, n_heads=n_heads, head_dim=hd,
                               hidden_dim=H, eps=eps)
    return pl.pallas_call(
        kernel,
        out_shape=jax.ShapeDtypeStruct((B, T, D), x.dtype),
        grid=(B, L),
        in_specs=[x_spec,
                  const((T, D)), const((T, D)), const((T, T)),
                  per_layer(1, D), per_layer(D, 3 * D), per_layer(D, D),
                  per_layer(1, D), per_layer(D, 2 * H), per_layer(H, D),
                  const((1, D))],
        out_specs=x_spec,
        scratch_shapes=[pltpu.VMEM((T, D), jnp.float32),     # residual carry
                        pltpu.VMEM((T, D), jnp.bfloat16)],   # per-head attn out
        compiler_params=pltpu.CompilerParams(
            dimension_semantics=("parallel", "arbitrary"),
            vmem_limit_bytes=vmem_limit),
        cost_estimate=cost,
    )(x, cos_full, sin_full, bias, anw, wqkv, wo, mnw, w13, w2, fnw)


# --------------------------------------------------------------------------
# Pure-JAX fp32 reference (mirrors the PyTorch forward semantics)
# --------------------------------------------------------------------------
def reference_forward(x, input_pos, params, cfg):
    B, T, D = x.shape
    n_heads = cfg["n_heads"]
    hd = D // n_heads
    eps = cfg["norm_eps"]

    inv = 1.0 / (cfg["rope_theta"] ** (jnp.arange(0, hd, 2, dtype=jnp.float32) / hd))
    freqs = input_pos.astype(jnp.float32)[:, None] * inv[None, :]    # (T, hd/2)
    c = jnp.cos(freqs)[None, None]
    s = jnp.sin(freqs)[None, None]

    def rmsnorm(z, w):
        return z * lax.rsqrt(jnp.mean(z * z, axis=-1, keepdims=True) + eps) * w

    def rope(q):  # (B, h, T, hd), interleaved/complex convention
        q_r, q_i = q[..., 0::2], q[..., 1::2]
        o_r = q_r * c - q_i * s
        o_i = q_r * s + q_i * c
        return jnp.stack([o_r, o_i], axis=-1).reshape(q.shape)

    f32 = lambda w: w.astype(jnp.float32)
    for layer in params["blocks"]:
        xn = rmsnorm(x, f32(layer["attn_norm_w"])[0])
        qkv = xn @ f32(layer["wqkv"])
        q, k, v = jnp.split(qkv, 3, axis=-1)
        to_heads = lambda t: t.reshape(B, T, n_heads, hd).transpose(0, 2, 1, 3)
        q, k, v = to_heads(q), to_heads(k), to_heads(v)
        q, k = rope(q), rope(k)
        sc = jnp.einsum("bhqd,bhkd->bhqk", q, k) / math.sqrt(hd)
        mask = jnp.tril(jnp.ones((T, T), bool))
        sc = jnp.where(mask[None, None], sc, -jnp.inf)
        p = jax.nn.softmax(sc, axis=-1)
        o = jnp.einsum("bhqk,bhkd->bhqd", p, v)
        o = o.transpose(0, 2, 1, 3).reshape(B, T, D)
        x = x + o @ f32(layer["wo"])
        xn2 = rmsnorm(x, f32(layer["mlp_norm_w"])[0])
        h1 = xn2 @ f32(layer["w1"])
        h3 = xn2 @ f32(layer["w3"])
        x = x + ((h1 * jax.nn.sigmoid(h1)) * h3) @ f32(layer["w2"])
    return rmsnorm(x, params["norm_w"][0])


# --------------------------------------------------------------------------
# Deterministic parameter init (weights stored in bf16, norms in fp32)
# --------------------------------------------------------------------------
def init_params(key, cfg):
    D = cfg["d_model"]
    H = llama_hidden_dim(D)
    blocks = []
    for layer in range(cfg["n_layers"]):
        k = jax.random.fold_in(key, layer)
        ks = jax.random.split(k, 7)
        scale = 0.05
        w = lambda kk, shape: (scale * jax.random.normal(kk, shape, jnp.float32)
                               ).astype(jnp.bfloat16)
        blocks.append(dict(
            attn_norm_w=1.0 + 0.1 * jax.random.normal(ks[0], (1, D), jnp.float32),
            mlp_norm_w=1.0 + 0.1 * jax.random.normal(ks[1], (1, D), jnp.float32),
            wqkv=w(ks[2], (D, 3 * D)),
            wo=w(ks[3], (D, D)),
            w1=w(ks[4], (D, H)),
            w3=w(ks[5], (D, H)),
            w2=w(ks[6], (H, D)),
        ))
    norm_w = 1.0 + 0.1 * jax.random.normal(jax.random.fold_in(key, 10_000),
                                           (1, D), jnp.float32)
    return dict(blocks=blocks, norm_w=norm_w)


# --------------------------------------------------------------------------
# Main
# --------------------------------------------------------------------------
if __name__ == "__main__":
    cfg = dict(
        n_layers=2,
        d_model=32,
        n_heads=4,
        n_kv_heads=4,     # == n_heads -> MHA path (no repeat_kv needed)
        norm_eps=1e-5,
        rope_theta=10000.0,
        max_seqlen=16,
    )
    B, T = 2, 8

    key = jax.random.PRNGKey(0)
    kx, kp = jax.random.split(key)
    x = jax.random.normal(kx, (B, T, cfg["d_model"]), jnp.float32)
    input_pos = jnp.arange(T, dtype=jnp.int32)
    params = init_params(kp, cfg)

    out = decoder_forward(x, input_pos, params, cfg)
    out = jax.block_until_ready(out)

    ref = reference_forward(x, input_pos, params, cfg)
    assert out.shape == (B, T, cfg["d_model"]), out.shape
    max_err = float(jnp.max(jnp.abs(out - ref)))
    # bf16 MXU operands + approx reciprocal -> loosened tolerance.
    assert jnp.allclose(out, ref, rtol=5e-2, atol=5e-2), f"max abs err {max_err}"

    print("KERNEL_OK")
</pallas_src>

<mosaic_0001>
module attributes {stable_mosaic.version = 11 : i64} {
  func.func @_decoder_kernel(%arg0: i32, %arg1: i32, %arg2: memref<1x8x32xf32, #tpu.memory_space<vmem>>, %arg3: memref<8x32xf32, #tpu.memory_space<vmem>>, %arg4: memref<8x32xf32, #tpu.memory_space<vmem>>, %arg5: memref<8x8xf32, #tpu.memory_space<vmem>>, %arg6: memref<1x1x32xf32, #tpu.memory_space<vmem>>, %arg7: memref<1x32x96xbf16, #tpu.memory_space<vmem>>, %arg8: memref<1x32x32xbf16, #tpu.memory_space<vmem>>, %arg9: memref<1x1x32xf32, #tpu.memory_space<vmem>>, %arg10: memref<1x32x512xbf16, #tpu.memory_space<vmem>>, %arg11: memref<1x256x32xbf16, #tpu.memory_space<vmem>>, %arg12: memref<1x32xf32, #tpu.memory_space<vmem>>, %arg13: memref<1x8x32xf32, #tpu.memory_space<vmem>>, %arg14: memref<8x32xf32, #tpu.memory_space<vmem>>, %arg15: memref<8x32xbf16, #tpu.memory_space<vmem>>) attributes {dimension_semantics = [#tpu.dimension_semantics<parallel>, #tpu.dimension_semantics<arbitrary>], iteration_bounds = array<i64: 2, 2>, scalar_prefetch = 0 : i64, scratch_operands = 2 : i64, tpu.core_type = #tpu.core_type<tc>, window_params = [{transform_indices = @transform_0, window_bounds = array<i64: 1, 8, 32>}, {pipeline_mode = #tpu.pipeline_mode<synchronous>, transform_indices = @transform_1, window_bounds = array<i64: 8, 32>}, {pipeline_mode = #tpu.pipeline_mode<synchronous>, transform_indices = @transform_2, window_bounds = array<i64: 8, 32>}, {pipeline_mode = #tpu.pipeline_mode<synchronous>, transform_indices = @transform_3, window_bounds = array<i64: 8, 8>}, {transform_indices = @transform_4, window_bounds = array<i64: 1, 1, 32>}, {transform_indices = @transform_5, window_bounds = array<i64: 1, 32, 96>}, {transform_indices = @transform_6, window_bounds = array<i64: 1, 32, 32>}, {transform_indices = @transform_7, window_bounds = array<i64: 1, 1, 32>}, {transform_indices = @transform_8, window_bounds = array<i64: 1, 32, 512>}, {transform_indices = @transform_9, window_bounds = array<i64: 1, 256, 32>}, {pipeline_mode = #tpu.pipeline_mode<synchronous>, transform_indices = @transform_10, window_bounds = array<i64: 1, 32>}, {transform_indices = @transform_11, window_bounds = array<i64: 1, 8, 32>}]} {
    %c0_i32 = arith.constant 0 : i32
    %0 = arith.cmpi eq, %arg1, %c0_i32 : i32
    %1 = arith.extui %0 : i1 to i32
    %c0_i32_0 = arith.constant 0 : i32
    %2 = arith.cmpi ne, %1, %c0_i32_0 : i32
    scf.if %2 {
      %c0_68 = arith.constant 0 : index
      %c0_69 = arith.constant 0 : index
      %c0_70 = arith.constant 0 : index
      %193 = vector.load %arg2[%c0_68, %c0_69, %c0_70] : memref<1x8x32xf32, #tpu.memory_space<vmem>>, vector<1x8x32xf32>
      %194 = vector.shape_cast %193 : vector<1x8x32xf32> to vector<8x32xf32>
      %c0_71 = arith.constant 0 : index
      %c0_72 = arith.constant 0 : index
      %195 = vector.load %arg14[%c0_71, %c0_72] : memref<8x32xf32, #tpu.memory_space<vmem>>, vector<8x32xf32>
      tpu.vector_store %arg14[%c0_71, %c0_72], %194 {strides = array<i32>} : memref<8x32xf32, #tpu.memory_space<vmem>>, vector<8x32xf32>,
    } else {
    }
    %c0 = arith.constant 0 : index
    %c0_1 = arith.constant 0 : index
    %3 = vector.load %arg14[%c0, %c0_1] : memref<8x32xf32, #tpu.memory_space<vmem>>, vector<8x32xf32>
    %c0_2 = arith.constant 0 : index
    %c0_3 = arith.constant 0 : index
    %c0_4 = arith.constant 0 : index
    %4 = vector.load %arg6[%c0_2, %c0_3, %c0_4] : memref<1x1x32xf32, #tpu.memory_space<vmem>>, vector<1x1x32xf32>
    %5 = vector.shape_cast %4 : vector<1x1x32xf32> to vector<1x32xf32>
    %6 = arith.mulf %3, %3 : vector<8x32xf32>
    %cst = arith.constant dense<0.000000e+00> : vector<8xf32>
    %7 = vector.multi_reduction <add>, %6, %cst [1] : vector<8x32xf32> to vector<8xf32>
    %8 = vector.shape_cast %7 : vector<8xf32> to vector<8x1xf32>
    %cst_5 = arith.constant 3.200000e+01 : f32
    %9 = vector.broadcast %cst_5 : f32 to vector<8x1xf32>
    %10 = arith.divf %8, %9 : vector<8x1xf32>
    %cst_6 = arith.constant 9.99999974E-6 : f32
    %11 = vector.broadcast %cst_6 : f32 to vector<8x1xf32>
    %12 = arith.addf %10, %11 : vector<8x1xf32>
    %13 = math.rsqrt %12 : vector<8x1xf32>
    %14 = vector.broadcast %13 : vector<8x1xf32> to vector<8x32xf32>
    %15 = arith.mulf %3, %14 : vector<8x32xf32>
    %16 = vector.broadcast %5 : vector<1x32xf32> to vector<8x32xf32>
    %17 = arith.mulf %15, %16 : vector<8x32xf32>
    %18 = arith.truncf %17 : vector<8x32xf32> to vector<8x32xbf16>
    %c0_7 = arith.constant 0 : index
    %c0_8 = arith.constant 0 : index
    %c0_9 = arith.constant 0 : index
    %19 = vector.load %arg7[%c0_7, %c0_8, %c0_9] : memref<1x32x96xbf16, #tpu.memory_space<vmem>>, vector<1x32x96xbf16>
    %20 = vector.shape_cast %19 : vector<1x32x96xbf16> to vector<32x96xbf16>
    %cst_10 = arith.constant dense<0.000000e+00> : vector<8x96xf32>
    %21 = tpu.matmul %18, %20, %cst_10 {dimension_numbers = #tpu.dot_dimension_numbers<[1], [0], [0], [1], [0, 0, 1, 1], [], []>} : vector<8x32xbf16>, vector<32x96xbf16>, vector<8x96xf32> -> vector<8x96xf32>
    %22 = vector.extract_strided_slice %21 {offsets = [0, 0], sizes = [8, 32], strides = [1, 1]} : vector<8x96xf32> to vector<8x32xf32>
    %cst_11 = arith.constant 0.353553385 : f32
    %23 = vector.broadcast %cst_11 : f32 to vector<8x32xf32>
    %24 = arith.mulf %22, %23 : vector<8x32xf32>
    %25 = vector.extract_strided_slice %21 {offsets = [0, 32], sizes = [8, 32], strides = [1, 1]} : vector<8x96xf32> to vector<8x32xf32>
    %26 = vector.extract_strided_slice %21 {offsets = [0, 64], sizes = [8, 32], strides = [1, 1]} : vector<8x96xf32> to vector<8x32xf32>
    %27 = arith.truncf %26 : vector<8x32xf32> to vector<8x32xbf16>
    %c0_12 = arith.constant 0 : index
    %c0_13 = arith.constant 0 : index
    %28 = vector.load %arg3[%c0_12, %c0_13] : memref<8x32xf32, #tpu.memory_space<vmem>>, vector<8x32xf32>
    %c0_14 = arith.constant 0 : index
    %c0_15 = arith.constant 0 : index
    %29 = vector.load %arg4[%c0_14, %c0_15] : memref<8x32xf32, #tpu.memory_space<vmem>>, vector<8x32xf32>
    %30 = tpu.iota {dimensions = array<i32: 1>} : vector<8x32xi32>
    %c8_i32 = arith.constant 8 : i32
    %c0_i32_16 = arith.constant 0 : i32
    %31 = arith.cmpi eq, %c8_i32, %c0_i32_16 : i32
    %c1_i32 = arith.constant 1 : i32
    %32 = arith.select %31, %c1_i32, %c8_i32 : i32
    %33 = vector.broadcast %32 : i32 to vector<8x32xi32>
    %34 = arith.remsi %30, %33 : vector<8x32xi32>
    %c0_i32_17 = arith.constant 0 : i32
    %35 = vector.broadcast %c0_i32_17 : i32 to vector<8x32xi32>
    %36 = arith.cmpi ne, %34, %35 : vector<8x32xi32>
    %c0_i32_18 = arith.constant 0 : i32
    %37 = vector.broadcast %c0_i32_18 : i32 to vector<8x32xi32>
    %38 = arith.cmpi slt, %34, %37 : vector<8x32xi32>
    %c0_i32_19 = arith.constant 0 : i32
    %39 = arith.cmpi slt, %32, %c0_i32_19 : i32
    %40 = vector.broadcast %39 : i1 to vector<8x32xi1>
    %41 = vector.broadcast %40 : vector<8x32xi1> to vector<8x32xi1>
    %42 = arith.xori %38, %41 : vector<8x32xi1>
    %43 = arith.andi %42, %36 : vector<8x32xi1>
    %44 = vector.broadcast %32 : i32 to vector<8x32xi32>
    %45 = arith.addi %34, %44 : vector<8x32xi32>
    %46 = arith.select %43, %45, %34 : vector<8x32xi1>, vector<8x32xi32>
    %c4_i32 = arith.constant 4 : i32
    %47 = vector.broadcast %c4_i32 : i32 to vector<8x32xi32>
    %48 = arith.cmpi slt, %46, %47 : vector<8x32xi32>
    %49 = vector.extract_strided_slice %24 {offsets = [0, 4], sizes = [8, 28], strides = [1, 1]} : vector<8x32xf32> to vector<8x28xf32>
    %50 = vector.extract_strided_slice %24 {offsets = [0, 0], sizes = [8, 4], strides = [1, 1]} : vector<8x32xf32> to vector<8x4xf32>
    %51 = tpu.concatenate %49, %50 in 1 : vector<8x28xf32>, vector<8x4xf32> -> vector<8x32xf32>
    %52 = vector.extract_strided_slice %24 {offsets = [0, 28], sizes = [8, 4], strides = [1, 1]} : vector<8x32xf32> to vector<8x4xf32>
    %53 = vector.extract_strided_slice %24 {offsets = [0, 0], sizes = [8, 28], strides = [1, 1]} : vector<8x32xf32> to vector<8x28xf32>
    %54 = tpu.concatenate %52, %53 in 1 : vector<8x4xf32>, vector<8x28xf32> -> vector<8x32xf32>
    %55 = arith.select %48, %51, %54 : vector<8x32xi1>, vector<8x32xf32>
    %56 = arith.mulf %24, %28 : vector<8x32xf32>
    %57 = arith.mulf %55, %29 : vector<8x32xf32>
    %58 = arith.addf %56, %57 : vector<8x32xf32>
    %59 = arith.truncf %58 : vector<8x32xf32> to vector<8x32xbf16>
    %60 = vector.extract_strided_slice %25 {offsets = [0, 4], sizes = [8, 28], strides = [1, 1]} : vector<8x32xf32> to vector<8x28xf32>
    %61 = vector.extract_strided_slice %25 {offsets = [0, 0], sizes = [8, 4], strides = [1, 1]} : vector<8x32xf32> to vector<8x4xf32>
    %62 = tpu.concatenate %60, %61 in 1 : vector<8x28xf32>, vector<8x4xf32> -> vector<8x32xf32>
    %63 = vector.extract_strided_slice %25 {offsets = [0, 28], sizes = [8, 4], strides = [1, 1]} : vector<8x32xf32> to vector<8x4xf32>
    %64 = vector.extract_strided_slice %25 {offsets = [0, 0], sizes = [8, 28], strides = [1, 1]} : vector<8x32xf32> to vector<8x28xf32>
    %65 = tpu.concatenate %63, %64 in 1 : vector<8x4xf32>, vector<8x28xf32> -> vector<8x32xf32>
    %66 = arith.select %48, %62, %65 : vector<8x32xi1>, vector<8x32xf32>
    %67 = arith.mulf %25, %28 : vector<8x32xf32>
    %68 = arith.mulf %66, %29 : vector<8x32xf32>
    %69 = arith.addf %67, %68 : vector<8x32xf32>
    %70 = arith.truncf %69 : vector<8x32xf32> to vector<8x32xbf16>
    %c0_20 = arith.constant 0 : index
    %c0_21 = arith.constant 0 : index
    %71 = vector.load %arg5[%c0_20, %c0_21] : memref<8x8xf32, #tpu.memory_space<vmem>>, vector<8x8xf32>
    %72 = vector.extract_strided_slice %59 {offsets = [0, 0], sizes = [8, 8], strides = [1, 1]} : vector<8x32xbf16> to vector<8x8xbf16>
    %73 = vector.extract_strided_slice %70 {offsets = [0, 0], sizes = [8, 8], strides = [1, 1]} : vector<8x32xbf16> to vector<8x8xbf16>
    %74 = tpu.transpose %73, [1, 0] : vector<8x8xbf16> -> vector<8x8xbf16>
    %cst_22 = arith.constant dense<0.000000e+00> : vector<8x8xf32>
    %75 = tpu.matmul %72, %74, %cst_22 {dimension_numbers = #tpu.dot_dimension_numbers<[1], [0], [0], [1], [0, 0, 1, 1], [], []>} : vector<8x8xbf16>, vector<8x8xbf16>, vector<8x8xf32> -> vector<8x8xf32>
    %76 = arith.addf %75, %71 : vector<8x8xf32>
    %cst_23 = arith.constant dense<0xFF800000> : vector<8xf32>
    %77 = vector.multi_reduction <maximumf>, %76, %cst_23 [1] : vector<8x8xf32> to vector<8xf32>
    %78 = vector.shape_cast %77 : vector<8xf32> to vector<8x1xf32>
    %79 = vector.broadcast %78 : vector<8x1xf32> to vector<8x8xf32>
    %80 = arith.subf %76, %79 : vector<8x8xf32>
    %81 = math.exp %80 : vector<8x8xf32>
    %cst_24 = arith.constant dense<0.000000e+00> : vector<8xf32>
    %82 = vector.multi_reduction <add>, %81, %cst_24 [1] : vector<8x8xf32> to vector<8xf32>
    %83 = vector.shape_cast %82 : vector<8xf32> to vector<8x1xf32>
    %84 = tpu.reciprocal %83 {approx = true} : vector<8x1xf32> -> vector<8x1xf32>
    %85 = vector.broadcast %84 : vector<8x1xf32> to vector<8x8xf32>
    %86 = arith.mulf %81, %85 : vector<8x8xf32>
    %87 = arith.truncf %86 : vector<8x8xf32> to vector<8x8xbf16>
    %88 = vector.extract_strided_slice %27 {offsets = [0, 0], sizes = [8, 8], strides = [1, 1]} : vector<8x32xbf16> to vector<8x8xbf16>
    %cst_25 = arith.constant dense<0.000000e+00> : vector<8x8xf32>
    %89 = tpu.matmul %87, %88, %cst_25 {dimension_numbers = #tpu.dot_dimension_numbers<[1], [0], [0], [1], [0, 0, 1, 1], [], []>} : vector<8x8xbf16>, vector<8x8xbf16>, vector<8x8xf32> -> vector<8x8xf32>
    %90 = arith.truncf %89 : vector<8x8xf32> to vector<8x8xbf16>
    %c0_26 = arith.constant 0 : index
    %c0_27 = arith.constant 0 : index
    %91 = vector.load %arg15[%c0_26, %c0_27] : memref<8x32xbf16, #tpu.memory_space<vmem>>, vector<8x8xbf16>
    tpu.vector_store %arg15[%c0_26, %c0_27], %90 {strides = array<i32>} : memref<8x32xbf16, #tpu.memory_space<vmem>>, vector<8x8xbf16>,
    %92 = vector.extract_strided_slice %59 {offsets = [0, 8], sizes = [8, 8], strides = [1, 1]} : vector<8x32xbf16> to vector<8x8xbf16>
    %93 = vector.extract_strided_slice %70 {offsets = [0, 8], sizes = [8, 8], strides = [1, 1]} : vector<8x32xbf16> to vector<8x8xbf16>
    %94 = tpu.transpose %93, [1, 0] : vector<8x8xbf16> -> vector<8x8xbf16>
    %cst_28 = arith.constant dense<0.000000e+00> : vector<8x8xf32>
    %95 = tpu.matmul %92, %94, %cst_28 {dimension_numbers = #tpu.dot_dimension_numbers<[1], [0], [0], [1], [0, 0, 1, 1], [], []>} : vector<8x8xbf16>, vector<8x8xbf16>, vector<8x8xf32> -> vector<8x8xf32>
    %96 = arith.addf %95, %71 : vector<8x8xf32>
    %cst_29 = arith.constant dense<0xFF800000> : vector<8xf32>
    %97 = vector.multi_reduction <maximumf>, %96, %cst_29 [1] : vector<8x8xf32> to vector<8xf32>
    %98 = vector.shape_cast %97 : vector<8xf32> to vector<8x1xf32>
    %99 = vector.broadcast %98 : vector<8x1xf32> to vector<8x8xf32>
    %100 = arith.subf %96, %99 : vector<8x8xf32>
    %101 = math.exp %100 : vector<8x8xf32>
    %cst_30 = arith.constant dense<0.000000e+00> : vector<8xf32>
    %102 = vector.multi_reduction <add>, %101, %cst_30 [1] : vector<8x8xf32> to vector<8xf32>
    %103 = vector.shape_cast %102 : vector<8xf32> to vector<8x1xf32>
    %104 = tpu.reciprocal %103 {approx = true} : vector<8x1xf32> -> vector<8x1xf32>
    %105 = vector.broadcast %104 : vector<8x1xf32> to vector<8x8xf32>
    %106 = arith.mulf %101, %105 : vector<8x8xf32>
    %107 = arith.truncf %106 : vector<8x8xf32> to vector<8x8xbf16>
    %108 = vector.extract_strided_slice %27 {offsets = [0, 8], sizes = [8, 8], strides = [1, 1]} : vector<8x32xbf16> to vector<8x8xbf16>
    %cst_31 = arith.constant dense<0.000000e+00> : vector<8x8xf32>
    %109 = tpu.matmul %107, %108, %cst_31 {dimension_numbers = #tpu.dot_dimension_numbers<[1], [0], [0], [1], [0, 0, 1, 1], [], []>} : vector<8x8xbf16>, vector<8x8xbf16>, vector<8x8xf32> -> vector<8x8xf32>
    %110 = arith.truncf %109 : vector<8x8xf32> to vector<8x8xbf16>
    %c0_32 = arith.constant 0 : index
    %c8 = arith.constant 8 : index
    %111 = vector.load %arg15[%c0_32, %c8] : memref<8x32xbf16, #tpu.memory_space<vmem>>, vector<8x8xbf16>
    tpu.vector_store %arg15[%c0_32, %c8], %110 {strides = array<i32>} : memref<8x32xbf16, #tpu.memory_space<vmem>>, vector<8x8xbf16>,
    %112 = vector.extract_strided_slice %59 {offsets = [0, 16], sizes = [8, 8], strides = [1, 1]} : vector<8x32xbf16> to vector<8x8xbf16>
    %113 = vector.extract_strided_slice %70 {offsets = [0, 16], sizes = [8, 8], strides = [1, 1]} : vector<8x32xbf16> to vector<8x8xbf16>
    %114 = tpu.transpose %113, [1, 0] : vector<8x8xbf16> -> vector<8x8xbf16>
    %cst_33 = arith.constant dense<0.000000e+00> : vector<8x8xf32>
    %115 = tpu.matmul %112, %114, %cst_33 {dimension_numbers = #tpu.dot_dimension_numbers<[1], [0], [0], [1], [0, 0, 1, 1], [], []>} : vector<8x8xbf16>, vector<8x8xbf16>, vector<8x8xf32> -> vector<8x8xf32>
    %116 = arith.addf %115, %71 : vector<8x8xf32>
    %cst_34 = arith.constant dense<0xFF800000> : vector<8xf32>
    %117 = vector.multi_reduction <maximumf>, %116, %cst_34 [1] : vector<8x8xf32> to vector<8xf32>
    %118 = vector.shape_cast %117 : vector<8xf32> to vector<8x1xf32>
    %119 = vector.broadcast %118 : vector<8x1xf32> to vector<8x8xf32>
    %120 = arith.subf %116, %119 : vector<8x8xf32>
    %121 = math.exp %120 : vector<8x8xf32>
    %cst_35 = arith.constant dense<0.000000e+00> : vector<8xf32>
    %122 = vector.multi_reduction <add>, %121, %cst_35 [1] : vector<8x8xf32> to vector<8xf32>
    %123 = vector.shape_cast %122 : vector<8xf32> to vector<8x1xf32>
    %124 = tpu.reciprocal %123 {approx = true} : vector<8x1xf32> -> vector<8x1xf32>
    %125 = vector.broadcast %124 : vector<8x1xf32> to vector<8x8xf32>
    %126 = arith.mulf %121, %125 : vector<8x8xf32>
    %127 = arith.truncf %126 : vector<8x8xf32> to vector<8x8xbf16>
    %128 = vector.extract_strided_slice %27 {offsets = [0, 16], sizes = [8, 8], strides = [1, 1]} : vector<8x32xbf16> to vector<8x8xbf16>
    %cst_36 = arith.constant dense<0.000000e+00> : vector<8x8xf32>
    %129 = tpu.matmul %127, %128, %cst_36 {dimension_numbers = #tpu.dot_dimension_numbers<[1], [0], [0], [1], [0, 0, 1, 1], [], []>} : vector<8x8xbf16>, vector<8x8xbf16>, vector<8x8xf32> -> vector<8x8xf32>
    %130 = arith.truncf %129 : vector<8x8xf32> to vector<8x8xbf16>
    %c0_37 = arith.constant 0 : index
    %c16 = arith.constant 16 : index
    %131 = vector.load %arg15[%c0_37, %c16] : memref<8x32xbf16, #tpu.memory_space<vmem>>, vector<8x8xbf16>
    tpu.vector_store %arg15[%c0_37, %c16], %130 {strides = array<i32>} : memref<8x32xbf16, #tpu.memory_space<vmem>>, vector<8x8xbf16>,
    %132 = vector.extract_strided_slice %59 {offsets = [0, 24], sizes = [8, 8], strides = [1, 1]} : vector<8x32xbf16> to vector<8x8xbf16>
    %133 = vector.extract_strided_slice %70 {offsets = [0, 24], sizes = [8, 8], strides = [1, 1]} : vector<8x32xbf16> to vector<8x8xbf16>
    %134 = tpu.transpose %133, [1, 0] : vector<8x8xbf16> -> vector<8x8xbf16>
    %cst_38 = arith.constant dense<0.000000e+00> : vector<8x8xf32>
    %135 = tpu.matmul %132, %134, %cst_38 {dimension_numbers = #tpu.dot_dimension_numbers<[1], [0], [0], [1], [0, 0, 1, 1], [], []>} : vector<8x8xbf16>, vector<8x8xbf16>, vector<8x8xf32> -> vector<8x8xf32>
    %136 = arith.addf %135, %71 : vector<8x8xf32>
    %cst_39 = arith.constant dense<0xFF800000> : vector<8xf32>
    %137 = vector.multi_reduction <maximumf>, %136, %cst_39 [1] : vector<8x8xf32> to vector<8xf32>
    %138 = vector.shape_cast %137 : vector<8xf32> to vector<8x1xf32>
    %139 = vector.broadcast %138 : vector<8x1xf32> to vector<8x8xf32>
    %140 = arith.subf %136, %139 : vector<8x8xf32>
    %141 = math.exp %140 : vector<8x8xf32>
    %cst_40 = arith.constant dense<0.000000e+00> : vector<8xf32>
    %142 = vector.multi_reduction <add>, %141, %cst_40 [1] : vector<8x8xf32> to vector<8xf32>
    %143 = vector.shape_cast %142 : vector<8xf32> to vector<8x1xf32>
    %144 = tpu.reciprocal %143 {approx = true} : vector<8x1xf32> -> vector<8x1xf32>
    %145 = vector.broadcast %144 : vector<8x1xf32> to vector<8x8xf32>
    %146 = arith.mulf %141, %145 : vector<8x8xf32>
    %147 = arith.truncf %146 : vector<8x8xf32> to vector<8x8xbf16>
    %148 = vector.extract_strided_slice %27 {offsets = [0, 24], sizes = [8, 8], strides = [1, 1]} : vector<8x32xbf16> to vector<8x8xbf16>
    %cst_41 = arith.constant dense<0.000000e+00> : vector<8x8xf32>
    %149 = tpu.matmul %147, %148, %cst_41 {dimension_numbers = #tpu.dot_dimension_numbers<[1], [0], [0], [1], [0, 0, 1, 1], [], []>} : vector<8x8xbf16>, vector<8x8xbf16>, vector<8x8xf32> -> vector<8x8xf32>
    %150 = arith.truncf %149 : vector<8x8xf32> to vector<8x8xbf16>
    %c0_42 = arith.constant 0 : index
    %c24 = arith.constant 24 : index
    %151 = vector.load %arg15[%c0_42, %c24] : memref<8x32xbf16, #tpu.memory_space<vmem>>, vector<8x8xbf16>
    tpu.vector_store %arg15[%c0_42, %c24], %150 {strides = array<i32>} : memref<8x32xbf16, #tpu.memory_space<vmem>>, vector<8x8xbf16>,
    %c0_43 = arith.constant 0 : index
    %c0_44 = arith.constant 0 : index
    %152 = vector.load %arg15[%c0_43, %c0_44] : memref<8x32xbf16, #tpu.memory_space<vmem>>, vector<8x32xbf16>
    %c0_45 = arith.constant 0 : index
    %c0_46 = arith.constant 0 : index
    %c0_47 = arith.constant 0 : index
    %153 = vector.load %arg8[%c0_45, %c0_46, %c0_47] : memref<1x32x32xbf16, #tpu.memory_space<vmem>>, vector<1x32x32xbf16>
    %154 = vector.shape_cast %153 : vector<1x32x32xbf16> to vector<32x32xbf16>
    %cst_48 = arith.constant dense<0.000000e+00> : vector<8x32xf32>
    %155 = tpu.matmul %152, %154, %cst_48 {dimension_numbers = #tpu.dot_dimension_numbers<[1], [0], [0], [1], [0, 0, 1, 1], [], []>} : vector<8x32xbf16>, vector<32x32xbf16>, vector<8x32xf32> -> vector<8x32xf32>
    %156 = arith.addf %3, %155 : vector<8x32xf32>
    %c0_49 = arith.constant 0 : index
    %c0_50 = arith.constant 0 : index
    %c0_51 = arith.constant 0 : index
    %157 = vector.load %arg9[%c0_49, %c0_50, %c0_51] : memref<1x1x32xf32, #tpu.memory_space<vmem>>, vector<1x1x32xf32>
    %158 = vector.shape_cast %157 : vector<1x1x32xf32> to vector<1x32xf32>
    %159 = arith.mulf %156, %156 : vector<8x32xf32>
    %cst_52 = arith.constant dense<0.000000e+00> : vector<8xf32>
    %160 = vector.multi_reduction <add>, %159, %cst_52 [1] : vector<8x32xf32> to vector<8xf32>
    %161 = vector.shape_cast %160 : vector<8xf32> to vector<8x1xf32>
    %cst_53 = arith.constant 3.200000e+01 : f32
    %162 = vector.broadcast %cst_53 : f32 to vector<8x1xf32>
    %163 = arith.divf %161, %162 : vector<8x1xf32>
    %cst_54 = arith.constant 9.99999974E-6 : f32
    %164 = vector.broadcast %cst_54 : f32 to vector<8x1xf32>
    %165 = arith.addf %163, %164 : vector<8x1xf32>
    %166 = math.rsqrt %165 : vector<8x1xf32>
    %167 = vector.broadcast %166 : vector<8x1xf32> to vector<8x32xf32>
    %168 = arith.mulf %156, %167 : vector<8x32xf32>
    %169 = vector.broadcast %158 : vector<1x32xf32> to vector<8x32xf32>
    %170 = arith.mulf %168, %169 : vector<8x32xf32>
    %171 = arith.truncf %170 : vector<8x32xf32> to vector<8x32xbf16>
    %c0_55 = arith.constant 0 : index
    %c0_56 = arith.constant 0 : index
    %c0_57 = arith.constant 0 : index
    %172 = vector.load %arg10[%c0_55, %c0_56, %c0_57] : memref<1x32x512xbf16, #tpu.memory_space<vmem>>, vector<1x32x512xbf16>
    %173 = vector.shape_cast %172 : vector<1x32x512xbf16> to vector<32x512xbf16>
    %cst_58 = arith.constant dense<0.000000e+00> : vector<8x512xf32>
    %174 = tpu.matmul %171, %173, %cst_58 {dimension_numbers = #tpu.dot_dimension_numbers<[1], [0], [0], [1], [0, 0, 1, 1], [], []>} : vector<8x32xbf16>, vector<32x512xbf16>, vector<8x512xf32> -> vector<8x512xf32>
    %175 = vector.extract_strided_slice %174 {offsets = [0, 0], sizes = [8, 256], strides = [1, 1]} : vector<8x512xf32> to vector<8x256xf32>
    %176 = vector.extract_strided_slice %174 {offsets = [0, 256], sizes = [8, 256], strides = [1, 1]} : vector<8x512xf32> to vector<8x256xf32>
    %177 = arith.negf %175 : vector<8x256xf32>
    %178 = math.exp %177 : vector<8x256xf32>
    %cst_59 = arith.constant 1.000000e+00 : f32
    %179 = vector.broadcast %cst_59 : f32 to vector<8x256xf32>
    %180 = arith.addf %179, %178 : vector<8x256xf32>
    %181 = arith.divf %179, %180 : vector<8x256xf32>
    %182 = arith.mulf %175, %181 : vector<8x256xf32>
    %183 = arith.mulf %182, %176 : vector<8x256xf32>
    %184 = arith.truncf %183 : vector<8x256xf32> to vector<8x256xbf16>
    %c0_60 = arith.constant 0 : index
    %c0_61 = arith.constant 0 : index
    %c0_62 = arith.constant 0 : index
    %185 = vector.load %arg11[%c0_60, %c0_61, %c0_62] : memref<1x256x32xbf16, #tpu.memory_space<vmem>>, vector<1x256x32xbf16>
    %186 = vector.shape_cast %185 : vector<1x256x32xbf16> to vector<256x32xbf16>
    %cst_63 = arith.constant dense<0.000000e+00> : vector<8x32xf32>
    %187 = tpu.matmul %184, %186, %cst_63 {dimension_numbers = #tpu.dot_dimension_numbers<[1], [0], [0], [1], [0, 0, 1, 1], [], []>} : vector<8x256xbf16>, vector<256x32xbf16>, vector<8x32xf32> -> vector<8x32xf32>
    %188 = arith.addf %156, %187 : vector<8x32xf32>
    %c0_64 = arith.constant 0 : index
    %c0_65 = arith.constant 0 : index
    %189 = vector.load %arg14[%c0_64, %c0_65] : memref<8x32xf32, #tpu.memory_space<vmem>>, vector<8x32xf32>
    tpu.vector_store %arg14[%c0_64, %c0_65], %188 {strides = array<i32>} : memref<8x32xf32, #tpu.memory_space<vmem>>, vector<8x32xf32>,
    %c1_i32_66 = arith.constant 1 : i32
    %190 = arith.cmpi eq, %arg1, %c1_i32_66 : i32
    %191 = arith.extui %190 : i1 to i32
    %c0_i32_67 = arith.constant 0 : i32
    %192 = arith.cmpi ne, %191, %c0_i32_67 : i32
    scf.if %192 {
      %c0_68 = arith.constant 0 : index
      %c0_69 = arith.constant 0 : index
      %193 = vector.load %arg12[%c0_68, %c0_69] : memref<1x32xf32, #tpu.memory_space<vmem>>, vector<1x32xf32>
      %194 = arith.mulf %188, %188 : vector<8x32xf32>
      %cst_70 = arith.constant dense<0.000000e+00> : vector<8xf32>
      %195 = vector.multi_reduction <add>, %194, %cst_70 [1] : vector<8x32xf32> to vector<8xf32>
      %196 = vector.shape_cast %195 : vector<8xf32> to vector<8x1xf32>
      %cst_71 = arith.constant 3.200000e+01 : f32
      %197 = vector.broadcast %cst_71 : f32 to vector<8x1xf32>
      %198 = arith.divf %196, %197 : vector<8x1xf32>
      %cst_72 = arith.constant 9.99999974E-6 : f32
      %199 = vector.broadcast %cst_72 : f32 to vector<8x1xf32>
      %200 = arith.addf %198, %199 : vector<8x1xf32>
      %201 = math.rsqrt %200 : vector<8x1xf32>
      %202 = vector.broadcast %201 : vector<8x1xf32> to vector<8x32xf32>
      %203 = arith.mulf %188, %202 : vector<8x32xf32>
      %204 = vector.broadcast %193 : vector<1x32xf32> to vector<8x32xf32>
      %205 = arith.mulf %203, %204 : vector<8x32xf32>
      %c0_73 = arith.constant 0 : index
      %c0_74 = arith.constant 0 : index
      %c0_75 = arith.constant 0 : index
      %206 = vector.load %arg13[%c0_73, %c0_74, %c0_75] : memref<1x8x32xf32, #tpu.memory_space<vmem>>, vector<1x8x32xf32>
      %207 = vector.shape_cast %206 : vector<1x8x32xf32> to vector<8x32xf32>
      %208 = vector.shape_cast %205 : vector<8x32xf32> to vector<1x8x32xf32>
      tpu.vector_store %arg13[%c0_73, %c0_74, %c0_75], %208 {strides = array<i32>} : memref<1x8x32xf32, #tpu.memory_space<vmem>>, vector<1x8x32xf32>,
    } else {
    }
    return
  }
  func.func @transform_0(%arg0: i32, %arg1: i32) -> (i32, i32, i32) {
    %c0_i32 = arith.constant 0 : i32
    %c0_i32_0 = arith.constant 0 : i32
    %c0_i32_1 = arith.constant 0 : i32
    return %arg0, %c0_i32, %c0_i32_0 : i32, i32, i32
  }
  func.func @transform_1(%arg0: i32, %arg1: i32) -> (i32, i32) {
    %c0_i32 = arith.constant 0 : i32
    %c0_i32_0 = arith.constant 0 : i32
    %c0_i32_1 = arith.constant 0 : i32
    return %c0_i32, %c0_i32_0 : i32, i32
  }
  func.func @transform_2(%arg0: i32, %arg1: i32) -> (i32, i32) {
    %c0_i32 = arith.constant 0 : i32
    %c0_i32_0 = arith.constant 0 : i32
    %c0_i32_1 = arith.constant 0 : i32
    return %c0_i32, %c0_i32_0 : i32, i32
  }
  func.func @transform_3(%arg0: i32, %arg1: i32) -> (i32, i32) {
    %c0_i32 = arith.constant 0 : i32
    %c0_i32_0 = arith.constant 0 : i32
    %c0_i32_1 = arith.constant 0 : i32
    return %c0_i32, %c0_i32_0 : i32, i32
  }
  func.func @transform_4(%arg0: i32, %arg1: i32) -> (i32, i32, i32) {
    %c0_i32 = arith.constant 0 : i32
    %c0_i32_0 = arith.constant 0 : i32
    %c0_i32_1 = arith.constant 0 : i32
    return %arg1, %c0_i32, %c0_i32_0 : i32, i32, i32
  }
  func.func @transform_5(%arg0: i32, %arg1: i32) -> (i32, i32, i32) {
    %c0_i32 = arith.constant 0 : i32
    %c0_i32_0 = arith.constant 0 : i32
    %c0_i32_1 = arith.constant 0 : i32
    return %arg1, %c0_i32, %c0_i32_0 : i32, i32, i32
  }
  func.func @transform_6(%arg0: i32, %arg1: i32) -> (i32, i32, i32) {
    %c0_i32 = arith.constant 0 : i32
    %c0_i32_0 = arith.constant 0 : i32
    %c0_i32_1 = arith.constant 0 : i32
    return %arg1, %c0_i32, %c0_i32_0 : i32, i32, i32
  }
  func.func @transform_7(%arg0: i32, %arg1: i32) -> (i32, i32, i32) {
    %c0_i32 = arith.constant 0 : i32
    %c0_i32_0 = arith.constant 0 : i32
    %c0_i32_1 = arith.constant 0 : i32
    return %arg1, %c0_i32, %c0_i32_0 : i32, i32, i32
  }
  func.func @transform_8(%arg0: i32, %arg1: i32) -> (i32, i32, i32) {
    %c0_i32 = arith.constant 0 : i32
    %c0_i32_0 = arith.constant 0 : i32
    %c0_i32_1 = arith.constant 0 : i32
    return %arg1, %c0_i32, %c0_i32_0 : i32, i32, i32
  }
  func.func @transform_9(%arg0: i32, %arg1: i32) -> (i32, i32, i32) {
    %c0_i32 = arith.constant 0 : i32
    %c0_i32_0 = arith.constant 0 : i32
    %c0_i32_1 = arith.constant 0 : i32
    return %arg1, %c0_i32, %c0_i32_0 : i32, i32, i32
  }
  func.func @transform_10(%arg0: i32, %arg1: i32) -> (i32, i32) {
    %c0_i32 = arith.constant 0 : i32
    %c0_i32_0 = arith.constant 0 : i32
    %c0_i32_1 = arith.constant 0 : i32
    return %c0_i32, %c0_i32_0 : i32, i32
  }
  func.func @transform_11(%arg0: i32, %arg1: i32) -> (i32, i32, i32) {
    %c0_i32 = arith.constant 0 : i32
    %c0_i32_0 = arith.constant 0 : i32
    %c0_i32_1 = arith.constant 0 : i32
    return %arg0, %c0_i32, %c0_i32_0 : i32, i32, i32
  }
}

</mosaic_0001>

<bundles_post_ra>
// kernel: tpu_custom_call.1
= control target key start
LH: loop header
LB: loop body
LE: loop exit
PB: predicated region body
PF: predicated region fallthrough
CT: control target
= control target key end

     0   :  { %s2548_s0 = inlined_call_operand.vmem [shape: f32[2,8,32], index: 0, kind: input, shape index: {}]   ;;  %s2549_s1 = inlined_call_operand.vmem [shape: f32[8,32], index: 1, kind: input, shape index: {}]   ;;  %s2550_s2 = inlined_call_operand.vmem [shape: f32[8,32], index: 2, kind: input, shape index: {}]   ;;  %s2551_s3 = inlined_call_operand.vmem [shape: f32[8,8], index: 3, kind: input, shape index: {}]   ;;  %s2552_s4 = inlined_call_operand.vmem [shape: f32[2,1,32], index: 4, kind: input, shape index: {}]   ;;  %s2553_s5 = inlined_call_operand.vmem [shape: bf16[2,32,96], index: 5, kind: input, shape index: {}]   ;;  %s2554_s6 = inlined_call_operand.vmem [shape: bf16[2,32,32], index: 6, kind: input, shape index: {}]   ;;  %s2555_s7 = inlined_call_operand.vmem [shape: f32[2,1,32], index: 7, kind: input, shape index: {}]   ;;  %s2556_s8 = inlined_call_operand.vmem [shape: bf16[2,32,512], index: 8, kind: input, shape index: {}]   ;;  %s2557_s9 = inlined_call_operand.vmem [shape: bf16[2,256,32], index: 9, kind: input, shape index: {}]   ;;  %s2558_s10 = inlined_call_operand.vmem [shape: f32[1,32], index: 10, kind: input, shape index: {}]   ;;  %s2559_s11 = inlined_call_operand.hbm [shape: f32[2,8,32], index: 11, kind: output, shape index: {}]  }
   0x1   :  { %2574 = sst [smem:[#allocation19_spill]] %s2548_s0 }
   0x2   :  { %2575 = sst [smem:[#allocation20_spill]] %s2559_s11 }
   0x3   :  { %16 = vsyncpa [#allocation5], 0 }
   0x4   :  { %18 = vsyncpa [#allocation5 + $0x1], 0  ;;  %s2222_s17 = smov 0   ;;  %s2224_s18 = smov 0  }
   0x5   :  { %s2226_s19 = smov 0   ;;  %s2228_s20 = smov 0  }
   0x6   :  { %s2230_s21 = smov 0   ;;  %s2232_s22 = smov 0  }
   0x7   :  { %s2234_s23 = smov 0   ;;  %s2236_s24 = smov 0  }
   0x8 LB: > { %2576 = sst [smem:[#allocation7_spill]] %s2107_s17  ;;  %s1702_s25 = sadd.s32 4294967295, %s2135_s24   ;;  %s2135_s24 = sphi %s2236_s24, %s24_s24   ;;  %s2131_s23 = sphi %s2234_s23, %s2608_s23   ;;  %s2127_s22 = sphi %s2232_s22, %s2607_s22   ;;  %s2123_s21 = sphi %s2230_s21, %s2606_s21   ;;  %s2119_s20 = sphi %s2228_s20, %s2605_s20   ;;  %s2115_s19 = sphi %s2226_s19, %s2604_s19   ;;  %s2111_s18 = sphi %s2224_s18, %s2603_s18   ;;  %s2107_s17 = sphi %s2222_s17, %s2602_s17  }
   0x9   : > { %2577 = sst [smem:[#allocation8_spill]] %s2111_s18  ;;  %s1703_s26 = sadd.s32 4294967294, %s2135_s24  }
   0xa   : > { %2578 = sst [smem:[#allocation9_spill]] %s2115_s19  ;;  %s33_s27 = sadd.s32 1, %s2127_s22 }
   0xb   : > { %2579 = sst [smem:[#allocation10_spill]] %s2123_s21  ;;  %p34_p0 = scmp.ge.s32.totalorder %s33_s27, 2 }
   0xc   : > { %2580 = sst [smem:[#allocation11_spill]] %s2127_s22  ;;  %s36_s28 = sadd.s32 1, %s2131_s23 }
   0xd   : > { %2581 = sst [smem:[#allocation12_spill]] %s2131_s23  ;;  %p319_p1 = scmp.ne.s32.totalorder %s2115_s19, %s2111_s18 }
   0xe   : > { %2582 = sst [smem:[#allocation13_spill]] %s2135_s24  ;;  %p320_p2 = scmp.eq.s32.totalorder %s1702_s25, 3 }
   0xf   : > { %s2610_s27 = smov (%p34_p0, %s33_s27), 0  ;;  %s2612_s28 = smov (!%p34_p0, %s36_s28), %s2131_s23 }
  0x10   : > { %2583 = sst [smem:[#allocation14_spill]] %s2610_s27  ;;  %p2271_p3 = por %p320_p2, %p319_p1 }
  0x11   : > { %p325_p4 = scmp.ne.s32.totalorder %s2111_s18, %s2107_s17  ;;  %p38_p5 = scmp.ge.s32.totalorder %s2612_s28, 2 }
  0x12   : > { %s2584_s29 = scalar_select %p2271_p3, 1, 0 }
  0x13   : > { %p326_p6 = scmp.eq.s32.totalorder %s1703_s26, 3  ;;  %p1706_p7 = scmp.ge.s32.totalorder %s2135_s24, 1 }
  0x14   : > { %2585 = sst [smem:[#allocation15_spill]] %s2584_s29  ;;  %p407_p8 = scmp.lt.s32.totalorder %s2135_s24, 5 }
  0x15   : > { %s2614_s28 = smov (%p38_p5, %s2612_s28), 0  ;;  %p2281_p9 = por %p326_p6, %p325_p4 }
  0x16   : > { %2586 = sst [smem:[#allocation16_spill]] %s2614_s28  ;;  %p408_p10 = pnand %p1706_p7, %p407_p8 }
  0x17   : > { %s2587_s30 = scalar_select %p2281_p9, 1, 0 }
  0x18   : > { %s306_s12 = ssub.s32 %s2131_s23, %s2614_s28  ;;  %s309_s13 = sadd.s32 1, %s2115_s19 }
  0x19   : > { %2588 = sst [smem:[#allocation17_spill]] %s2587_s30  ;;  %p307_p11 = scmp.eq.s32.totalorder %s306_s12, 0 }
  0x1a   : > { %411 = sbr.rel (%p408_p10) target bundleno = 3122 (0xc32), region = 64  ;;  %s2563_s15 = sand.u32 (!%p408_p10), 1, %s2111_s18  }
  0x1b   : > { %s2289_s14 = scalar_select %p307_p11, %s2115_s19, %s309_s13  }
  0x1c   : > { %p472_p12 = scmp.lt.s32.totalorder (!%p408_p10), %s2123_s21, 1  ;;  %s2295_s16 = sshll.u32 (!%p408_p10), %s2563_s15, 3 }
  0x1d   : > { %2589 = sst [smem:[#allocation18_spill]] %s2289_s14  ;;  %p476_p13 = scmp.lt.s32.totalorder (!%p408_p10), %s2119_s20, 1 }
  0x1e   : > { %s2590_s0 = sld [smem:[#allocation19_spill]] (!%p408_p10)  ;;  %s471_s30 = scalar_lea.vmem (!%p408_p10), [#allocation4], %s2295_s16 }
  0x1f   : > { %s473_s25 = scalar_select %p472_p12, %s2123_s21, 1 }
  0x20   : > { %s2300_s26 = scalar_select %p476_p13, %s2119_s20, 1 }
  0x21   : > { %s1708_s12 = sshll.u32 %s473_s25, 3  ;;  %p1717_p0 = scmp.ne.s32.totalorder %s2119_s20, 0 }
  0x22   : > { %s1771_s14 = sshll.u32 %s2300_s26, 4  ;;  %s491_s17 = scalar_lea.vmem %s2555_s7, %s2300_s26 }
  0x23   : > { %s483_s29 = scalar_lea.vmem %s2553_s5, %s1771_s14  ;;  %s2320_s25 = scalar_lea.vmem %s2554_s6, %s1771_s14 }
  0x24   : > { %s475_s27 = scalar_lea.vmem %s2590_s0, %s1708_s12  ;;  %s1773_s28 = sshll.u32 %s2300_s26, 6 }
  0x25   : > { %s1774_s12 = sshll.u32 %s2300_s26, 7  ;;  %s2327_s22 = scalar_lea.vmem %s2556_s8, %s1773_s28 }
  0x26   : > { %s2332_s19 = scalar_lea.vmem %s2557_s9, %s1774_s12  ;;  %506 = sbr.rel (%p1717_p0) target bundleno = 45 (0x2d), region = 68 }
  0x2b   : > { %v507_v0 = vld [vmem:[%s475_s27] sm:$0xff]  ;;  %vm508_vm0 = vcmask 261120  }
  0x2c   : > { %509 = vst.msk [vmem:[#allocation2] sm:$0xff] %vm508_vm0, %v507_v0 }
  0x2d PF: > { %vm513_vm1 = vcmask 261120   ;;  %v1981_v4 = vld [vmem:[%s483_s29 + $0x8] sm:$0xff]   ;;  %v2137_v5 = vmov 0.0   ;;  %vm2138_vm2 = vmmov 0   ;;  %v1982_v6 = vld [vmem:[%s483_s29] sm:$0xff]   ;;  %s2591_s18 = scalar_lea.vmem %s2552_s4, %s2300_s26  ;;  %s2139_s21 = smov 124   ;;  %v593_v21 = vlaneseq }
  0x2e   : > { %1822 = vmatprep.subr.bf16.mxu1 %v2137_v5  ;;  %1826 = vmatprep.mubr.msk.bf16.mxu1 %vm2138_vm2, %v2137_v5  ;;  %v1718_v11 = vld [vmem:[%s2591_s18] ss:$0 sm:$0xff]  ;;  %s2140_s24 = smov 92   ;;  %s2141_s27 = smov 68   ;;  %vm615_vm3 = vcmask 228352   ;;  %vm623_vm4 = vcmask 31744  }
  0x2f   : > { %1823 = vmatpush3.bf16.msra.mxu1 %v1981_v4  ;;  %1848 = vmatprep.subr.bf16.mxu0 %v2137_v5  ;;  %s2142_s29 = smov 100   ;;  %v591_v20 = vld [vmem:[%s2549_s1] sm:$0xff]  ;;  %s2143_s28 = smov 32   ;;  %v594_v22 = vand.u32 127, %v593_v21  ;;  %vm662_vm6 = vcmask 64512   ;;  %vm727_vm7 = vcmask 1043456  }
  0x30   : > { %1824 = vmatprep.subr.bf16.mxu1 %v2137_v5  ;;  %1850 = vmatprep.mubr.msk.bf16.mxu0 %vm2138_vm2, %v2137_v5  ;;  %v592_v29 = vld [vmem:[%s2550_s2] sm:$0xff]  ;;  %s2144_s23 = smov 28   ;;  %s2145_s0 = smov 4   ;;  %vm772_vm8 = vcmask 60416   ;;  %vm892_vm9 = vcmask 126016   ;;  %vm1011_vm10 = vcmask 191616  }
  0x31   : > { %v599_v24 = vand.u32 7, %v594_v22  ;;  %s2146_s11 = smov 96   ;;  %v2394_v52 = vld [vmem:[%s2551_s3] sm:$0xff]  ;;  %s2150_s14 = smov 104   ;;  %vm1130_vm11 = vcmask 257216  }
  0x32   : > { %s2151_s15 = smov 64   ;;  %s2153_s12 = smov 72  }
  0x33   : > { %v2336_v1 = vld [vmem:[#allocation2] sm:$0xff]  ;;  %1825 = vmatpush3.bf16.msra.mxu1 %v1982_v6  ;;  %vm2369_vm5 = vcmp.lt.s32.totalorder %v599_v24, 4  ;;  %s2154_s13 = smov 56   ;;  %s2158_s18 = smov 16  }
  0x34   : > { %v512_v2 = vmul.f32 %v2336_v1, %v2336_v1  ;;  %1830 = vmatprep.subr.bf16.mxu1 %v2137_v5  ;;  %p1765_p1 = scmp.ne.s32.totalorder %s2119_s20, 1 }
  0x36   : > { %v514_v3 = vsel %vm513_vm1, %v512_v2, 0.0 }
  0x37   : > { %515 = vadd.xlane.f32.xlu0 %v514_v3 }
  0xc0   : > { %v516_v7 = vpop.xlane.xlu0 %515 }
  0xc1   : > { %v518_v8 = vmul.f32 0.03125, %v516_v7 }
  0xc3   : > { %v519_v9 = vadd.f32 1e-05, %v518_v8 }
  0xc5   : > { %2013 = vrsqrt.f32 %v519_v9 }
  0xd2   : > { %v2014_v10 = vpop.eup %2013 }
  0xd3   : > { %v521_v12 = vmul.f32 %v2014_v10, %v2336_v1 }
  0xd5   : > { %v528_v13 = vmul.f32 %v1718_v11, %v521_v12 }
  0xd7   : > { %v529_v14 = vpack.c.bf16 %v528_v13, %v528_v13 }
  0xd9   : > { %1827 = vmatmul.mubr.msk.bf16.vlgmr.msra.gmra.mxu1 %vm513_vm1, %v529_v14 }
  0xda   : > { %1832 = vmatprep.mubr.msk.bf16.mxu1 %vm2138_vm2, %v2137_v5 }
 0x199   : > { %v2358_v15 = vpop.f32.mrf.mxu1 }
 0x19a   : > { %634 = vrot.lane.b32.xlu1 %v2358_v15, %s2139_s21  ;;  %631 = vrot.lane.b32.xlu0 %v2358_v15, %s2140_s24  ;;  %v589_v17 = vmul.f32 0.35355338, %v2358_v15  ;;  %s2147_s24 = smov 88   ;;  %v2401_v0 = vpack.c.bf16 %v2358_v15, %v2358_v15 }
 0x19b   : > { %v1828_v16 = vpop.f32.mrf.mxu1 }
 0x19c   : > { %v626_v48 = vmul.f32 %v591_v20, %v589_v17 }
 0x19d   : > { %v586_v18 = vpop.f32.mrf.mxu1 }
 0x19e   : > { %638 = vrot.lane.b32.xlu1 %v2358_v15, %s2141_s27  ;;  %617 = vrot.lane.b32.xlu0 %v589_v17, %s2142_s29  ;;  %s2148_s27 = smov 120  }
 0x19f   : > { %v1829_v19 = vpop.f32.mrf.mxu1 }
 0x1a2   : > { %641 = vrot.lane.b32.xlu1 %v2358_v15, %s2142_s29  ;;  %s2149_s29 = smov 112  }
 0x1a6   : > { %647 = vrot.lane.b32.xlu1 %v591_v20, %s2143_s28 }
 0x20c   : > { %v635_v23 = vpop.permute.xlu1 %634  ;;  %v632_v26 = vpop.permute.xlu0 %631 }
 0x20d   : > { %v637_v30 = vsel %vm615_vm3, %v632_v26, %v635_v23 }
 0x210   : > { %v639_v25 = vpop.permute.xlu1 %638  ;;  %v618_v42 = vpop.permute.xlu0 %617 }
 0x214   : > { %v642_v28 = vpop.permute.xlu1 %641 }
 0x215   : > { %v644_v31 = vsel %vm623_vm4, %v639_v25, %v642_v28 }
 0x216   : > { %v645_v32 = vsel %vm2369_vm5, %v637_v30, %v644_v31 }
 0x217   : > { %v651_v33 = vmul.f32 %v645_v32, %v592_v29 }
 0x218   : > { %v648_v34 = vpop.permute.xlu1 %647 }
 0x219   : > { %653 = vrot.lane.b32.xlu1 %v651_v33, %s2143_s28  ;;  %v650_v35 = vmul.f32 %v648_v34, %v2358_v15  ;;  %s2152_s28 = smov 80  }
 0x21d   : > { %609 = vrot.lane.b32.xlu1 %v589_v17, %s2139_s21  ;;  %s2159_s21 = smov 24  }
 0x221   : > { %612 = vrot.lane.b32.xlu1 %v589_v17, %s2144_s23  ;;  %s2155_s23 = smov 40  }
 0x225   : > { %620 = vrot.lane.b32.xlu1 %v589_v17, %s2145_s0  ;;  %s2156_s0 = smov 48  }
 0x28b   : > { %v654_v36 = vpop.permute.xlu1 %653 }
 0x28c   : > { %v656_v37 = vadd.f32 %v654_v36, %v650_v35 }
 0x28e   : > { %v657_v38 = vpack.c.bf16 %v656_v37, %v656_v37 }
 0x28f   : > { %v610_v39 = vpop.permute.xlu1 %609 }
 0x290   : > { %660 = vrot.lane.b32.xlu0 %v657_v38, %s2146_s11  ;;  %s2157_s11 = smov 8  }
 0x293   : > { %v613_v40 = vpop.permute.xlu1 %612 }
 0x294   : > { %v616_v44 = vsel %vm615_vm3, %v610_v39, %v613_v40 }
 0x297   : > { %v621_v41 = vpop.permute.xlu1 %620 }
 0x298   : > { %v624_v43 = vsel %vm623_vm4, %v618_v42, %v621_v41 }
 0x299   : > { %v625_v45 = vsel %vm2369_vm5, %v616_v44, %v624_v43 }
 0x29a   : > { %v627_v46 = vmul.f32 %v625_v45, %v592_v29 }
 0x29c   : > { %v628_v50 = vadd.f32 %v627_v46, %v626_v48 }
 0x29e   : > { %v629_v51 = vpack.c.bf16 %v628_v50, %v628_v50 }
 0x302   : > { %v661_v47 = vpop.permute.xlu0 %660 }
 0x303   : > { %v667_v49 = vsel %vm662_vm6, %v661_v47, 0 }
 0x304   : > { %1831 = vmatpush3.bf16.xpose.msra.mxu1 %v667_v49 }
 0x305   : > { %1836 = vmatprep.subr.bf16.mxu1 %v2137_v5 }
 0x30b   : > { %1833 = vmatmul.mubr.msk.bf16.vlgmr.msra.gmra.mxu1 %vm662_vm6, %v629_v51 }
 0x30c   : > { %1838 = vmatprep.mubr.msk.bf16.mxu1 %vm2138_vm2, %v2137_v5 }
 0x3cb   : > { %v703_v53 = vpop.f32.mrf.mxu1 }
 0x3cc   : > { %v704_v54 = vadd.f32 %v703_v53, %v2394_v52 }
 0x3cd   : > { %v1834_v55 = vpop.f32.mrf.mxu1 }
 0x3ce   : > { %v709_v56 = vsel %vm662_vm6, %v704_v54, -inf }
 0x3cf   : > { %710 = vmax.xlane.f32.xlu1 %v709_v56  ;;  %v706_v57 = vpop.f32.mrf.mxu1 }
 0x3d1   : > { %v1835_v58 = vpop.f32.mrf.mxu1 }
 0x3e0   : > { %777 = vrot.lane.b32.xlu1 %v657_v38, %s2147_s24 }
 0x3e4   : > { %775 = vrot.lane.b32.xlu1 %v629_v51, %s2148_s27 }
 0x3e8   : > { %894 = vrot.lane.b32.xlu1 %v629_v51, %s2149_s29 }
 0x3ec   : > { %1013 = vrot.lane.b32.xlu1 %v629_v51, %s2150_s14 }
 0x458   : > { %v711_v59 = vpop.xlane.xlu1 %710 }
 0x459   : > { %v712_v60 = vsub.f32 %v704_v54, %v711_v59 }
 0x45b   : > { %v713_v61 = vmul.f32 1.442695, %v712_v60 }
 0x45c   : > { %v778_v8 = vpop.permute.xlu1 %777 }
 0x45d   : > { %2015 = vpow2.f32 %v713_v61  ;;  %v783_v10 = vsel %vm662_vm6, %v778_v8, 0 }
 0x460   : > { %v776_v12 = vpop.permute.xlu1 %775 }
 0x464   : > { %v895_v15 = vpop.permute.xlu1 %894 }
 0x468   : > { %v1014_v17 = vpop.permute.xlu1 %1013 }
 0x46a   : > { %v2016_v62 = vpop.eup %2015 }
 0x46b   : > { %v715_v63 = vsel %vm662_vm6, %v2016_v62, 0.0 }
 0x46c   : > { %716 = vadd.xlane.f32.xlu0 %v715_v63 }
 0x482   : > { %722 = vrot.lane.b32.xlu0 %v2401_v0, %s2151_s15 }
 0x486   : > { %896 = vrot.lane.b32.xlu0 %v657_v38, %s2152_s28 }
 0x48a   : > { %1015 = vrot.lane.b32.xlu0 %v657_v38, %s2153_s12 }
 0x4f5   : > { %v717_v2 = vpop.xlane.xlu0 %716 }
 0x4f6   : > { %2017 = vrcp.f32 %v717_v2 }
 0x4f9   : > { %v723_v3 = vpop.permute.xlu0 %722 }
 0x4fa   : > { %v729_v4 = vsel %vm727_vm7, %v723_v3, 0 }
 0x4fb   : > { %1837 = vmatpush3.bf16.msra.mxu1 %v729_v4 }
 0x4fc   : > { %1842 = vmatprep.subr.bf16.mxu1 %v2137_v5 }
 0x4fd   : > { %v897_v11 = vpop.permute.xlu0 %896 }
 0x4fe   : > { %v902_v13 = vsel %vm662_vm6, %v897_v11, 0 }
 0x501   : > { %v1016_v14 = vpop.permute.xlu0 %1015 }
 0x502   : > { %v1021_v16 = vsel %vm662_vm6, %v1016_v14, 0 }
 0x503   : > { %v2018_v6 = vpop.eup %2017 }
 0x504   : > { %v719_v7 = vmul.f32 %v2018_v6, %v2016_v62 }
 0x506   : > { %v720_v9 = vpack.c.bf16 %v719_v7, %v719_v7 }
 0x508   : > { %1839 = vmatmul.mubr.msk.bf16.vlgmr.msra.gmra.mxu1 %vm662_vm6, %v720_v9 }
 0x509   : > { %1843 = vmatpush3.bf16.xpose.msra.mxu1 %v783_v10  ;;  %1844 = vmatprep.mubr.msk.bf16.mxu1 %vm2138_vm2, %v2137_v5 }
 0x50a   : > { %1854 = vmatprep.subr.bf16.mxu1 %v2137_v5 }
 0x510   : > { %1845 = vmatmul.mubr.msk.bf16.vlgmr.msra.gmra.mxu1 %vm662_vm6, %v776_v12 }
 0x511   : > { %1855 = vmatpush3.bf16.xpose.msra.mxu1 %v902_v13  ;;  %1856 = vmatprep.mubr.msk.bf16.mxu1 %vm2138_vm2, %v2137_v5 }
 0x512   : > { %1866 = vmatprep.subr.bf16.mxu1 %v2137_v5 }
 0x518   : > { %1857 = vmatmul.mubr.msk.bf16.vlgmr.msra.gmra.mxu1 %vm662_vm6, %v895_v15 }
 0x519   : > { %1867 = vmatpush3.bf16.xpose.msra.mxu1 %v1021_v16  ;;  %1868 = vmatprep.mubr.msk.bf16.mxu1 %vm2138_vm2, %v2137_v5 }
 0x51a   : > { %1878 = vmatprep.subr.bf16.mxu1 %v2137_v5 }
 0x520   : > { %1869 = vmatmul.mubr.msk.bf16.vlgmr.msra.gmra.mxu1 %vm662_vm6, %v1014_v17  ;;  %v1983_v17 = vld [vmem:[%s2320_s25 + $0x8] sm:$0xff]  }
 0x521   : > { %1882 = vmatprep.mubr.msk.bf16.mxu1 %vm2138_vm2, %v2137_v5  ;;  %1879 = vmatpush3.bf16.msra.mxu1 %v1983_v17 }
 0x522   : > { %1880 = vmatprep.subr.bf16.mxu1 %v2137_v5 }
 0x5c8   : > { %v765_v18 = vpop.f32.mrf.mxu1 }
 0x5c9   : > { %v771_v19 = vpack.c.bf16 %v765_v18, %v765_v18 }
 0x5ca   : > { %v1840_v20 = vpop.f32.mrf.mxu1 }
 0x5cb   : > { %773 = vst.msk [vmem:[#allocation3] sm:$0xf] %vm772_vm8, %v771_v19  ;;  %v1984_v19 = vld [vmem:[%s2320_s25] sm:$0xff]  }
 0x5cc   : > { %v768_v21 = vpop.f32.mrf.mxu1  ;;  %1881 = vmatpush3.bf16.msra.mxu1 %v1984_v19 }
 0x5ce   : > { %v1841_v22 = vpop.f32.mrf.mxu1 }
 0x5d0   : > { %v819_v23 = vpop.f32.mrf.mxu1 }
 0x5d1   : > { %v820_v24 = vadd.f32 %v819_v23, %v2394_v52 }
 0x5d2   : > { %v1846_v25 = vpop.f32.mrf.mxu1 }
 0x5d3   : > { %v825_v26 = vsel %vm662_vm6, %v820_v24, -inf }
 0x5d4   : > { %826 = vmax.xlane.f32.xlu0 %v825_v26  ;;  %v822_v27 = vpop.f32.mrf.mxu1 }
 0x5d6   : > { %v1847_v28 = vpop.f32.mrf.mxu1 }
 0x5d8   : > { %v938_v29 = vpop.f32.mrf.mxu1 }
 0x5d9   : > { %v939_v30 = vadd.f32 %v938_v29, %v2394_v52 }
 0x5da   : > { %v1858_v31 = vpop.f32.mrf.mxu1 }
 0x5db   : > { %v944_v32 = vsel %vm662_vm6, %v939_v30, -inf }
 0x5dc   : > { %945 = vmax.xlane.f32.xlu1 %v944_v32  ;;  %v941_v33 = vpop.f32.mrf.mxu1 }
 0x5de   : > { %v1859_v34 = vpop.f32.mrf.mxu1 }
 0x5e0   : > { %v1057_v35 = vpop.f32.mrf.mxu1 }
 0x5e1   : > { %v1058_v36 = vadd.f32 %v1057_v35, %v2394_v52 }
 0x5e2   : > { %v1870_v37 = vpop.f32.mrf.mxu1 }
 0x5e3   : > { %v1063_v38 = vsel %vm662_vm6, %v1058_v36, -inf }
 0x5e4   : > { %1064 = vmax.xlane.f32.xlu0 %v1063_v38  ;;  %v1060_v39 = vpop.f32.mrf.mxu1 }
 0x5e5   : > { %v1985_v39 = vld [vmem:[%s2327_s22 + $0x20] ss:$16 sps:$4 sm:$0xff]  }
 0x5e6   : > { %v1871_v40 = vpop.f32.mrf.mxu1 }
 0x5e7   : > { %v1987_v40 = vld [vmem:[%s2327_s22 + $0x24] ss:$16 sps:$4 sm:$0xff]  }
 0x5ed   : > { %837 = vrot.lane.b32.xlu1 %v2401_v0, %s2154_s13 }
 0x65d   : > { %v827_v41 = vpop.xlane.xlu0 %826 }
 0x65e   : > { %v828_v42 = vsub.f32 %v820_v24, %v827_v41  ;;  %v1988_v41 = vld [vmem:[%s2327_s22 + $0x28] ss:$16 sps:$4 sm:$0xff]  }
 0x660   : > { %v829_v43 = vmul.f32 1.442695, %v828_v42  ;;  %v1990_v42 = vld [vmem:[%s2327_s22 + $0x2c] ss:$16 sps:$4 sm:$0xff]  }
 0x661   : > { %1314 = vmatprep.subr.bf16.mxu1 %v1990_v42 }
 0x662   : > { %2019 = vpow2.f32 %v829_v43  ;;  %v1993_v43 = vld [vmem:[%s2327_s22 + $0x4] ss:$16 sps:$4 sm:$0xff]  }
 0x665   : > { %v946_v44 = vpop.xlane.xlu1 %945 }
 0x666   : > { %v947_v45 = vsub.f32 %v939_v30, %v946_v44  ;;  %v1996_v44 = vld [vmem:[%s2327_s22 + $0xc] ss:$16 sps:$4 sm:$0xff]  }
 0x668   : > { %v948_v46 = vmul.f32 1.442695, %v947_v45  ;;  %v1994_v45 = vld [vmem:[%s2327_s22 + $0x8] ss:$16 sps:$4 sm:$0xff]  }
 0x669   : > { %v838_v47 = vpop.permute.xlu1 %837 }
 0x66a   : > { %2021 = vpow2.f32 %v948_v46  ;;  %v843_v48 = vsel %vm727_vm7, %v838_v47, 0  ;;  %v2160_v46 = vmov 0  }
 0x66b   : > { %1849 = vmatpush3.bf16.msra.mxu0 %v843_v48 }
 0x66c   : > { %1860 = vmatprep.subr.bf16.mxu0 %v2137_v5 }
 0x66d   : > { %v1065_v49 = vpop.xlane.xlu0 %1064 }
 0x66e   : > { %v1066_v50 = vsub.f32 %v1058_v36, %v1065_v49 }
 0x66f   : > { %v2020_v51 = vpop.eup %2019 }
 0x670   : > { %v1067_v52 = vmul.f32 1.442695, %v1066_v50  ;;  %v831_v53 = vsel %vm662_vm6, %v2020_v51, 0.0 }
 0x671   : > { %832 = vadd.xlane.f32.xlu0 %v831_v53 }
 0x672   : > { %2023 = vpow2.f32 %v1067_v52 }
 0x677   : > { %v2022_v54 = vpop.eup %2021 }
 0x678   : > { %v950_v55 = vsel %vm662_vm6, %v2022_v54, 0.0 }
 0x679   : > { %951 = vadd.xlane.f32.xlu1 %v950_v55  ;;  %v1997_v55 = vld [vmem:[%s2332_s19 + $0x78] sm:$0xff]  }
 0x67f   : > { %v2024_v56 = vpop.eup %2023 }
 0x680   : > { %v1069_v57 = vsel %vm662_vm6, %v2024_v56, 0.0 }
 0x681   : > { %1070 = vadd.xlane.f32.xlu0 %v1069_v57  ;;  %v1999_v57 = vld [vmem:[%s2332_s19 + $0x70] sm:$0xff]  }
 0x68a   : > { %1075 = vrot.lane.b32.xlu1 %v2401_v0, %s2155_s23 }
 0x697   : > { %956 = vrot.lane.b32.xlu0 %v2401_v0, %s2156_s0 }
 0x6fa   : > { %v833_v58 = vpop.xlane.xlu0 %832 }
 0x6fb   : > { %2025 = vrcp.f32 %v833_v58  ;;  %v2000_v58 = vld [vmem:[%s2332_s19 + $0x30] sm:$0xff]  }
 0x702   : > { %v952_v59 = vpop.xlane.xlu1 %951 }
 0x703   : > { %2027 = vrcp.f32 %v952_v59  ;;  %v2001_v59 = vld [vmem:[%s2332_s19 + $0x68] sm:$0xff]  }
 0x706   : > { %v1076_v6 = vpop.permute.xlu1 %1075 }
 0x707   : > { %v1081_v8 = vsel %vm727_vm7, %v1076_v6, 0  ;;  %v2010_v6 = vld [vmem:[%s2332_s19 + $0x8] sm:$0xff]  }
 0x708   : > { %v2026_v60 = vpop.eup %2025 }
 0x709   : > { %v835_v61 = vmul.f32 %v2026_v60, %v2020_v51  ;;  %v1736_v51 = vld [vmem:[%s491_s17] ss:$0 sm:$0xff]  ;;  %v2002_v60 = vld [vmem:[%s2332_s19 + $0x28] sm:$0xff]  }
 0x70a   : > { %v1071_v62 = vpop.xlane.xlu0 %1070 }
 0x70b   : > { %2029 = vrcp.f32 %v1071_v62  ;;  %v836_v63 = vpack.c.bf16 %v835_v61, %v835_v61  ;;  %v2003_v61 = vld [vmem:[%s2332_s19 + $0x60] sm:$0xff]  }
 0x70c   : > { %v2004_v62 = vld [vmem:[%s2332_s19 + $0x20] sm:$0xff]  }
 0x70d   : > { %1851 = vmatmul.mubr.msk.bf16.vlgmr.msra.gmra.mxu0 %vm662_vm6, %v836_v63  ;;  %v2005_v63 = vld [vmem:[%s2332_s19 + $0x58] sm:$0xff]  }
 0x70e   : > { %v957_v2 = vpop.permute.xlu0 %956  ;;  %1862 = vmatprep.mubr.msk.bf16.mxu0 %vm2138_vm2, %v2137_v5 }
 0x70f   : > { %v962_v3 = vsel %vm727_vm7, %v957_v2, 0  ;;  %v2006_v2 = vld [vmem:[%s2332_s19 + $0x18] sm:$0xff]  }
 0x710   : > { %v2028_v4 = vpop.eup %2027  ;;  %1861 = vmatpush3.bf16.msra.mxu0 %v962_v3  ;;  %v2007_v3 = vld [vmem:[%s2332_s19 + $0x50] sm:$0xff]  }
 0x711   : > { %1872 = vmatprep.subr.bf16.mxu0 %v2137_v5  ;;  %v954_v0 = vmul.f32 %v2028_v4, %v2022_v54  ;;  %v2008_v4 = vld [vmem:[%s2332_s19 + $0x10] sm:$0xff]  }
 0x713   : > { %v955_v7 = vpack.c.bf16 %v954_v0, %v954_v0  ;;  %v2009_v0 = vld [vmem:[%s2332_s19 + $0x48] sm:$0xff]  }
 0x715   : > { %1863 = vmatmul.mubr.msk.bf16.vlgmr.msra.gmra.mxu0 %vm662_vm6, %v955_v7  ;;  %v2011_v7 = vld [vmem:[%s2332_s19 + $0x40] sm:$0xff]  }
 0x716   : > { %1873 = vmatpush3.bf16.msra.mxu0 %v1081_v8  ;;  %1874 = vmatprep.mubr.msk.bf16.mxu0 %vm2138_vm2, %v2137_v5  ;;  %v2012_v8 = vld [vmem:[%s2332_s19] sm:$0xff]  }
 0x717   : > { %1273 = vmatprep.subr.bf16.mxu0 %v1987_v40 }
 0x718   : > { %v2030_v9 = vpop.eup %2029 }
 0x719   : > { %v1073_v10 = vmul.f32 %v2030_v9, %v2024_v56  ;;  %v1998_v56 = vld [vmem:[%s2332_s19 + $0x38] sm:$0xff]  }
 0x71b   : > { %v1074_v11 = vpack.c.bf16 %v1073_v10, %v1073_v10 }
 0x71d   : > { %1875 = vmatmul.mubr.msk.bf16.vlgmr.msra.gmra.mxu0 %vm662_vm6, %v1074_v11 }
 0x71e   : > { %1274 = vmatpush1.bf16.msra.mxu0 %v1985_v39  ;;  %1293 = vmatprep.mubr.bf16.mxu0 %v2160_v46 }
 0x71f   : > { %1275 = vmatprep.subr.bf16.mxu0 %v1993_v43 }
 0x7cd   : > { %v879_v12 = vpop.f32.mrf.mxu0 }
 0x7ce   : > { %v1775_v13 = vpack.c.bf16 %v879_v12, %v879_v12 }
 0x7cf   : > { %v1852_v14 = vpop.f32.mrf.mxu0 }
 0x7d0   : > { %889 = vrot.lane.b32.xlu1 %v1775_v13, %s2157_s11 }
 0x7d1   : > { %v882_v15 = vpop.f32.mrf.mxu0 }
 0x7d3   : > { %v1853_v16 = vpop.f32.mrf.mxu0 }
 0x7d5   : > { %v998_v18 = vpop.f32.mrf.mxu0 }
 0x7d6   : > { %v1776_v20 = vpack.c.bf16 %v998_v18, %v998_v18 }
 0x7d7   : > { %v1864_v21 = vpop.f32.mrf.mxu0 }
 0x7d8   : > { %1008 = vrot.lane.b32.xlu0 %v1776_v20, %s2158_s18 }
 0x7d9   : > { %v1001_v22 = vpop.f32.mrf.mxu0 }
 0x7db   : > { %v1865_v23 = vpop.f32.mrf.mxu0 }
 0x7dd   : > { %v1117_v24 = vpop.f32.mrf.mxu0 }
 0x7de   : > { %v1777_v25 = vpack.c.bf16 %v1117_v24, %v1117_v24 }
 0x7df   : > { %v1876_v26 = vpop.f32.mrf.mxu0 }
 0x7e0   : > { %1127 = vrot.lane.b32.xlu1 %v1777_v25, %s2159_s21 }
 0x7e1   : > { %v1120_v27 = vpop.f32.mrf.mxu0 }
 0x7e3   : > { %v1877_v28 = vpop.f32.mrf.mxu0 }
 0x842   : > { %v890_v29 = vpop.permute.xlu1 %889 }
 0x843   : > { %893 = vst.msk [vmem:[#allocation3] sm:$0xf] %vm892_vm9, %v890_v29 }
 0x84a   : > { %v1009_v30 = vpop.permute.xlu0 %1008 }
 0x84b   : > { %1012 = vst.msk [vmem:[#allocation3] sm:$0xf] %vm1011_vm10, %v1009_v30 }
 0x852   : > { %v1128_v5 = vpop.permute.xlu1 %1127 }
 0x853   : > { %1131 = vst.msk [vmem:[#allocation3] sm:$0xf] %vm1130_vm11, %v1128_v5 }
 0x85a   : > { %v1132_v31 = vld [vmem:[#allocation3] sm:$0xf] }
 0x85b   : > { %1883 = vmatmul.mubr.msk.bf16.vlgmr.msra.gmra.mxu1 %vm513_vm1, %v1132_v31 }
 0x85c   : > { %1315 = vmatpush1.bf16.msra.mxu1 %v1988_v41  ;;  %1334 = vmatprep.mubr.bf16.mxu1 %v2160_v46 }
 0x85d   : > { %1316 = vmatprep.subr.bf16.mxu1 %v1996_v44 }
 0x860   : > { %1317 = vmatpush1.bf16.msra.mxu1 %v1994_v45 }
 0x91b   : > { %v1186_v32 = vpop.f32.mrf.mxu1 }
 0x91c   : > { %v2453_v33 = vadd.f32 %v1186_v32, %v2336_v1  ;;  %v1991_v1 = vld [vmem:[%s2327_s22] ss:$16 sps:$4 sm:$0xff]  }
 0x91d   : > { %v1884_v34 = vpop.f32.mrf.mxu1  ;;  %1276 = vmatpush1.bf16.msra.mxu0 %v1991_v1 }
 0x91e   : > { %v1194_v35 = vmul.f32 %v2453_v33, %v2453_v33  ;;  %1800 = vmatprep.subr.bf16.mxu0 %v1997_v55 }
 0x91f   : > { %v1189_v36 = vpop.f32.mrf.mxu1 }
 0x920   : > { %v1195_v37 = vsel %vm513_vm1, %v1194_v35, 0.0 }
 0x921   : > { %1196 = vadd.xlane.f32.xlu0 %v1195_v37  ;;  %v1885_v38 = vpop.f32.mrf.mxu1 }
 0x9aa   : > { %v1197_v47 = vpop.xlane.xlu0 %1196 }
 0x9ab   : > { %v1198_v48 = vmul.f32 0.03125, %v1197_v47 }
 0x9ad   : > { %v1199_v49 = vadd.f32 1e-05, %v1198_v48 }
 0x9af   : > { %2031 = vrsqrt.f32 %v1199_v49 }
 0x9bc   : > { %v2032_v50 = vpop.eup %2031 }
 0x9bd   : > { %v1201_v52 = vmul.f32 %v2032_v50, %v2453_v33 }
 0x9bf   : > { %v1208_v53 = vmul.f32 %v1736_v51, %v1201_v52 }
 0x9c1   : > { %v1209_v54 = vpack.c.bf16 %v1208_v53, %v1208_v53 }
 0x9c3   : > { %1745 = vmatmul.mubr.msk.bf16.vlgmr.msra.gmra.mxu0 %vm513_vm1, %v1209_v54  ;;  %1746 = vmatmul.mubr.msk.bf16.vlgmr.msra.gmra.mxu1 %vm513_vm1, %v1209_v54 }
 0x9c4   : > { %1801 = vmatpush3.bf16.msra.mxu0 %v1998_v56 }
 0x9c5   : > { %1802 = vmatprep.subr.bf16.mxu0 %v1999_v57 }
 0x9c8   : > { %1803 = vmatpush3.bf16.msra.mxu0 %v2000_v58 }
 0x9c9   : > { %1804 = vmatprep.subr.bf16.mxu0 %v2001_v59 }
 0x9cc   : > { %1805 = vmatpush3.bf16.msra.mxu0 %v2002_v60 }
 0x9cd   : > { %1806 = vmatprep.subr.bf16.mxu0 %v2003_v61 }
 0x9d0   : > { %1807 = vmatpush3.bf16.msra.mxu0 %v2004_v62 }
 0x9d1   : > { %1808 = vmatprep.subr.bf16.mxu0 %v2005_v63 }
 0x9d4   : > { %1809 = vmatpush3.bf16.msra.mxu0 %v2006_v2 }
 0x9d5   : > { %1810 = vmatprep.subr.bf16.mxu0 %v2007_v3 }
 0x9d8   : > { %1811 = vmatpush3.bf16.msra.mxu0 %v2008_v4 }
 0x9d9   : > { %1812 = vmatprep.subr.bf16.mxu0 %v2009_v0 }
 0x9dc   : > { %1813 = vmatpush3.bf16.msra.mxu0 %v2010_v6 }
 0x9dd   : > { %1814 = vmatprep.subr.bf16.mxu0 %v2011_v7 }
 0x9e0   : > { %1815 = vmatpush3.bf16.msra.mxu0 %v2012_v8 }
 0xa83   : > { %v1295_v9 = vpop.f32.mrf.mxu0  ;;  %v1336_v10 = vpop.f32.mrf.mxu1 }
 0xa84   : > { %v1747_v11 = vmul.f32 -1.442695, %v1295_v9 }
 0xa85   : > { %v1297_v12 = vpop.f32.mrf.mxu0  ;;  %v1338_v13 = vpop.f32.mrf.mxu1 }
 0xa86   : > { %2033 = vpow2.f32 %v1747_v11  ;;  %v1748_v14 = vmul.f32 -1.442695, %v1297_v12 }
 0xa87   : > { %v1299_v15 = vpop.f32.mrf.mxu0  ;;  %v1340_v16 = vpop.f32.mrf.mxu1 }
 0xa88   : > { %2035 = vpow2.f32 %v1748_v14 }
 0xa89   : > { %v1300_v17 = vpop.f32.mrf.mxu0  ;;  %v1341_v18 = vpop.f32.mrf.mxu1 }
 0xa93   : > { %v2034_v19 = vpop.eup %2033 }
 0xa94   : > { %v1349_v20 = vadd.f32 1.0, %v2034_v19 }
 0xa95   : > { %v2036_v21 = vpop.eup %2035 }
 0xa96   : > { %2037 = vrcp.f32 %v1349_v20  ;;  %v1350_v22 = vadd.f32 1.0, %v2036_v21 }
 0xa98   : > { %2039 = vrcp.f32 %v1350_v22 }
 0xaa3   : > { %v2038_v23 = vpop.eup %2037 }
 0xaa4   : > { %v1355_v24 = vmul.f32 %v2038_v23, %v1295_v9 }
 0xaa5   : > { %v2040_v25 = vpop.eup %2039 }
 0xaa6   : > { %v1356_v26 = vmul.f32 %v2040_v25, %v1297_v12  ;;  %v1357_v27 = vmul.f32 %v1355_v24, %v1336_v10 }
 0xaa8   : > { %v1358_v28 = vmul.f32 %v1356_v26, %v1338_v13  ;;  %v1359_v30 = vpack.c.bf16 %v1357_v27, %v1357_v27 }
 0xaaa   : > { %v1360_v29 = vpack.c.bf16 %v1358_v28, %v1358_v28 }
 0xaac   : > { %1521 = vmatprep.mubr.bf16.mxu0 %v1360_v29 }
 0xaad   : > { %1522 = vmatmul.mubr.bf16.vlgmr.msra.gmra.mxu0 %v1359_v30 }
 0xb6d   : > { %v1816_v5 = vpop.f32.mrf.mxu0 }
 0xb6f   : > { %v1817_v31 = vpop.f32.mrf.mxu0 }
 0xb70   : > { %v1818_v32 = vadd.f32 %v1817_v31, %v1816_v5  ;;  %1534 = sbr.rel (%p1765_p1) target bundleno = 3097 (0xc19), region = 72 }
 0xb71   : > { %v1819_v34 = vpop.f32.mrf.mxu0 }
 0xb72   : > { %v1529_v35 = vadd.f32 %v1818_v32, %v2453_v33 }
 0xb73   : > { %v1820_v36 = vpop.f32.mrf.mxu0 }
 0xb74   : > { %1530 = vst.msk [vmem:[#allocation2] sm:$0xff] %vm513_vm1, %v1529_v35 }
 0xb75   : > { %v1536_v37 = vmul.f32 %v1529_v35, %v1529_v35  ;;  %v1766_v33 = vld [vmem:[%s2558_s10] ss:$0 sm:$0xff] }
 0xb77   : > { %v1537_v38 = vsel %vm513_vm1, %v1536_v37, 0.0 }
 0xb78   : > { %1538 = vadd.xlane.f32.xlu0 %v1537_v38 }
 0xc01   : > { %v1539_v39 = vpop.xlane.xlu0 %1538 }
 0xc02   : > { %v1540_v40 = vmul.f32 0.03125, %v1539_v39 }
 0xc04   : > { %v1541_v41 = vadd.f32 1e-05, %v1540_v40 }
 0xc06   : > { %2041 = vrsqrt.f32 %v1541_v41 }
 0xc13   : > { %v2042_v42 = vpop.eup %2041 }
 0xc14   : > { %v1543_v43 = vmul.f32 %v2042_v42, %v1529_v35 }
 0xc16   : > { %v1550_v44 = vmul.f32 %v1766_v33, %v1543_v43 }
 0xc18   : > { %1551 = vst.msk [vmem:[%s471_s30] sm:$0xff] %vm513_vm1, %v1550_v44 }
 0xc19 PF: > { %s2594_s20 = sld [smem:[#allocation10_spill]]  ;;  %s1566_s12 = sshll.u32 %s471_s30, 4  ;;  %s1567_s12 = int_to_ptr.vmem [resolvable:$true] %s1566_s12 }
 0xc1a   : > { %s2595_s22 = sld [smem:[#allocation8_spill]]  ;;  %s2043_s0 = scalar_lea.vmem %s1567_s12, 128 }
 0xc1b   : > { %s2597_s15 = sld [smem:[#allocation20_spill]]  ;;  %p2044_p2 = scmp.ne.s32.totalorder %s1567_s12, %s2043_s0 }
 0xc1c   : > { %s2161_s11 = smov [#allocation4]  }
 0xc1d   : > { %p2045_p4 = pnand %p2044_p2, %p2271_p3  ;;  %s2047_s18 = sshll.u32 %s2161_s11, 4  ;;  %s2048_s18 = int_to_ptr.vmem [resolvable:$false] %s2047_s18 }
 0xc1e   : > { %s2049_s21 = scalar_lea.vmem %s2048_s18, 256  ;;  %p2050_p6 = scmp.lt.s32.totalorder %s1567_s12, %s2048_s18 }
 0xc1f   : > { %s1768_s27 = sshll.u32 %s2594_s20, 7  ;;  %p2046_p5 = pneg %p2045_p4 }
 0xc20   : > { %s2598_s13 = sand.u32 1, %s2595_s22   ;;  %p2051_p7 = scmp.lt.s32.totalorder %s2049_s21, %s2043_s0 }
 0xc21   : > { %s1564_s28 = scalar_lea.hbm %s2597_s15, %s1768_s27  ;;  %s1553_s23 = scalar_lea.sflag [#allocation5], %s2598_s13 }
 0xc22   : > { %p2052_p8 = por %p2051_p7, %p2050_p6 }
 0xc24   : > { %p2053_p10 = pnand %p2052_p8, %p2046_p5 }
 0xc26   : > { %2056 = shalt.err (!%p2053_p10)
}
 0xc27   : > { %s2057_s25 = scalar_lea.hbm %s1564_s28, 128  ;;  %s2061_s24 = scalar_lea.hbm %s2597_s15, 256 }
 0xc28   : > { %p2058_p11 = scmp.ne.s32.totalorder %s1564_s28, %s2057_s25  ;;  %p2062_p0 = scmp.lt.s32.totalorder %s1564_s28, %s2597_s15 }
 0xc29   : > { %p2063_p1 = scmp.lt.s32.totalorder %s2061_s24, %s2057_s25 }
 0xc2a   : > { %p2059_p12 = pnand %p2058_p11, %p2271_p3 }
 0xc2b   : > { %p2064_p2 = por %p2063_p1, %p2062_p0 }
 0xc2c   : > { %p2060_p13 = pneg %p2059_p12 }
 0xc2e   : > { %p2065_p4 = pnand %p2064_p2, %p2060_p13 }
 0xc30   : > { %2068 = shalt.err (!%p2065_p4)
}
 0xc31   : > { %1886 = dma.vmem_to_hbm [thread:$0]  (%p2271_p3), %s1567_s12, 128, %s1564_s28, %s1553_s23  }
 0xc32 PF: > { %s2599_s20 = sld [smem:[#allocation13_spill]] }
 0xc33   : > { %s2600_s22 = sld [smem:[#allocation7_spill]] }
 0xc38   : > { %p1892_p5 = scmp.ge.s32.totalorder %s2599_s20, 2 }
 0xc39   : > { %s1578_s29 = sand.u32 1, %s2600_s22  }
 0xc3a   : > { %p1889_p6 = pnand %p1892_p5, %p2281_p9  ;;  %s1579_s14 = scalar_lea.sflag [#allocation5], %s1578_s29 }
 0xc3c   : > { %p1890_p7 = pneg %p1889_p6 }
 0xc3e   : > { %2102 = dma.done.wait (%p1890_p7), %s1579_s14, 128  }
 0xc3f   : > { %2104 = vsyncadd (%p1890_p7), %s1579_s14, 4294967168  ;;  %s24_s24 = sadd.s32 1, %s2599_s20   ;;  %s2602_s17 = sld [smem:[#allocation8_spill]] }
 0xc40   : > { %p21_p8 = scmp.ge.s32.totalorder %s24_s24, 6   ;;  %s2603_s18 = sld [smem:[#allocation9_spill]] }
 0xc41   : > { %s2604_s19 = sld [smem:[#allocation18_spill]] }
 0xc42   : > { %s2605_s20 = sld [smem:[#allocation11_spill]]  ;;  %23 = sbr.rel (!%p21_p8) target bundleno = 8 (0x8), region = 125 }
 0xc43   : > { %s2606_s21 = sld [smem:[#allocation12_spill]] }
 0xc44   : > { %s2607_s22 = sld [smem:[#allocation14_spill]] }
 0xc45   : > { %s2608_s23 = sld [smem:[#allocation16_spill]] }
 0xc47   :  { %1584 = vsyncpa [#allocation5], 1 }
 0xc48   :  { %1586 = vsyncpa [#allocation5 + $0x1], 1 }

</bundles_post_ra>
